<compile_context>
chip_gen: v7x
topology: tpu7x:2x2x1
jax: 0.10.0
libtpu: 0.0.40
codegen_flags: <defaults>
</compile_context>

<pallas_src>
import functools

import jax
import jax.numpy as jnp
from jax.experimental import pallas as pl
from jax.experimental.pallas import tpu as pltpu


_VMEM_LIMIT = 32 * 1024 * 1024  # safe on v7x (64 MiB physical) and v5e/v6e


# ----------------------------------------------------------------------------
# Small XLA-side layout helpers (no data expansion, just layout)
# ----------------------------------------------------------------------------
def _pad_axis(arr, axis, target):
    pad = target - arr.shape[axis]
    if pad == 0:
        return arr
    widths = [(0, 0)] * arr.ndim
    widths[axis] = (0, pad)
    return jnp.pad(arr, widths)


def _space_to_depth2(x):
    """(N, H, W, C) -> (N, H//2, W//2, 4*C); channel order (row-off, col-off, C)."""
    N, H, W, C = x.shape
    x = x.reshape(N, H // 2, 2, W // 2, 2, C)
    x = jnp.transpose(x, (0, 1, 3, 2, 4, 5))
    return x.reshape(N, H // 2, W // 2, 4 * C)


def _weight_k4s2_to_k2(w_oihw):
    """(Cout, Cin, 4, 4) -> (2, 2, 4*Cin, Cout), K-order matching _space_to_depth2."""
    Cout, Cin, _, _ = w_oihw.shape
    w = jnp.transpose(w_oihw, (2, 3, 1, 0))        # (kh, kw, Cin, Cout)
    w = w.reshape(2, 2, 2, 2, Cin, Cout)           # (a, r, b, s, Cin, Cout); kh=2a+r, kw=2b+s
    w = jnp.transpose(w, (0, 2, 1, 3, 4, 5))       # (a, b, r, s, Cin, Cout)
    return w.reshape(2, 2, 4 * Cin, Cout)


# ----------------------------------------------------------------------------
# Pallas kernels
# ----------------------------------------------------------------------------
def _conv_k2s1_kernel(x_ref, w_ref, b_ref, o_ref, *stat_refs,
                      negative_slope, emit_stats):
    """Fused k=2/s=1 conv (== original k=4/s=2 conv after space-to-depth).

    x_ref: (1, Ho+1, Wo+1, K) bf16  -- whole (space-to-depth'd, padded) image in VMEM
    w_ref: (2, 2, K, Cout)    bf16
    b_ref: (1, Cout)          f32
    o_ref: (1, Ho, Wo, Cout)
    stat_refs (emit_stats): per-image channel sum / sum-of-squares, (1,1,Cout) f32.
    """
    Ho, Wo, Cout = o_ref.shape[1], o_ref.shape[2], o_ref.shape[3]
    K = x_ref.shape[3]
    x = x_ref[0]                                   # (Ho+1, Wo+1, K) bf16

    acc = jnp.zeros((Ho * Wo, Cout), jnp.float32)
    for dy in range(2):
        for dx in range(2):
            patch = x[dy:dy + Ho, dx:dx + Wo, :].reshape(Ho * Wo, K)
            acc = acc + jnp.dot(patch, w_ref[dy, dx],
                                preferred_element_type=jnp.float32)

    y = acc + b_ref[...]                           # conv output (pre-activation), f32

    if emit_stats:
        # BN batch statistics from the f32 accumulator (before any bf16 rounding).
        sum_ref, sq_ref = stat_refs
        sum_ref[...] = jnp.sum(y, axis=0, keepdims=True).reshape(1, 1, Cout)
        sq_ref[...] = jnp.sum(y * y, axis=0, keepdims=True).reshape(1, 1, Cout)

    if negative_slope is not None:
        y = jnp.where(y >= 0, y, negative_slope * y)

    o_ref[...] = y.reshape(1, Ho, Wo, Cout).astype(o_ref.dtype)


def _bn_lrelu_conv_k4s1_kernel(x_ref, w_ref, b_ref, scale_ref, shift_ref, o_ref,
                               *, negative_slope):
    """BN(scale/shift) + LeakyReLU fused into the k=4/s=1 conv.

    x_ref: (1, Ho+3, Wo+3, C) bf16  -- RAW conv2 output, zero-padded by 1 spatially.
    BN + LeakyReLU are applied in f32 in-kernel; the padding border is re-zeroed
    because the reference network zero-pads AFTER the activation.
    """
    Hp, Wp, C = x_ref.shape[1], x_ref.shape[2], x_ref.shape[3]
    Ho, Wo, Coutp = o_ref.shape[1], o_ref.shape[2], o_ref.shape[3]

    x = x_ref[0].astype(jnp.float32)               # (Hp, Wp, C)
    y = x * scale_ref[...] + shift_ref[...]
    y = jnp.where(y >= 0, y, negative_slope * y)

    row = jax.lax.broadcasted_iota(jnp.int32, (Hp, Wp, 1), 0)
    col = jax.lax.broadcasted_iota(jnp.int32, (Hp, Wp, 1), 1)
    interior = (row >= 1) & (row < Hp - 1) & (col >= 1) & (col < Wp - 1)
    act = jnp.where(interior, y, 0.0).astype(jnp.bfloat16)

    acc = jnp.zeros((Ho * Wo, Coutp), jnp.float32)
    for di in range(4):
        for dj in range(4):
            patch = act[di:di + Ho, dj:dj + Wo, :].reshape(Ho * Wo, C)
            acc = acc + jnp.dot(patch, w_ref[di, dj],
                                preferred_element_type=jnp.float32)

    o_ref[...] = (acc + b_ref[...]).reshape(1, Ho, Wo, Coutp).astype(o_ref.dtype)


# ----------------------------------------------------------------------------
# pallas_call wrappers
# ----------------------------------------------------------------------------
def conv_k4s2(x_nhwc, w_oihw, bias, *, negative_slope, out_dtype,
              emit_stats=False):
    """Conv2d(k=4, s=2, p=1) with optional fused LeakyReLU and BN-statistics outputs."""
    N, H, W, Cin = x_nhwc.shape
    assert H % 2 == 0 and W % 2 == 0, "k=4/s=2/p=1 path expects even spatial dims"
    Cout = w_oihw.shape[0]
    Ho, Wo = H // 2, W // 2
    K = 4 * Cin

    # cast to bf16 BEFORE padding / layout changes (halves glue traffic)
    xp = jnp.pad(x_nhwc.astype(jnp.bfloat16), ((0, 0), (1, 1), (1, 1), (0, 0)))
    x2 = _space_to_depth2(xp)                                  # (N, Ho+1, Wo+1, K)
    w2 = _weight_k4s2_to_k2(w_oihw).astype(jnp.bfloat16)       # (2, 2, K, Cout)
    b2 = bias.reshape(1, Cout).astype(jnp.float32)

    out_shape = jax.ShapeDtypeStruct((N, Ho, Wo, Cout), out_dtype)
    out_spec = pl.BlockSpec((1, Ho, Wo, Cout), lambda n: (n, 0, 0, 0))
    if emit_stats:
        stat_shape = jax.ShapeDtypeStruct((N, 1, Cout), jnp.float32)
        stat_spec = pl.BlockSpec((1, 1, Cout), lambda n: (n, 0, 0))
        out_shapes = (out_shape, stat_shape, stat_shape)
        out_specs = (out_spec, stat_spec, stat_spec)
    else:
        out_shapes = out_shape
        out_specs = out_spec

    kern = functools.partial(_conv_k2s1_kernel,
                             negative_slope=negative_slope,
                             emit_stats=emit_stats)
    return pl.pallas_call(
        kern,
        out_shape=out_shapes,
        grid_spec=pltpu.PrefetchScalarGridSpec(
            num_scalar_prefetch=0,
            grid=(N,),
            in_specs=[
                pl.BlockSpec((1, Ho + 1, Wo + 1, K), lambda n: (n, 0, 0, 0)),
                pl.BlockSpec((2, 2, K, Cout), lambda n: (0, 0, 0, 0)),
                pl.BlockSpec((1, Cout), lambda n: (0, 0)),
            ],
            out_specs=out_specs,
        ),
        compiler_params=pltpu.CompilerParams(
            dimension_semantics=("parallel",),
            vmem_limit_bytes=_VMEM_LIMIT,
        ),
    )(x2, w2, b2)


def bn_lrelu_conv_k4s1(x_nhwc, w_oihw, bias, scale, shift, *,
                       negative_slope=0.2, out_dtype=jnp.float32, cout_pad=128):
    """BN(scale/shift) + LeakyReLU + Conv2d(k=4, s=1, p=1), fully fused per image."""
    N, H, W, C = x_nhwc.shape
    Cout = w_oihw.shape[0]
    Coutp = max(cout_pad, Cout)
    Ho, Wo = H - 1, W - 1                          # (H + 2 - 4) + 1

    xp = jnp.pad(x_nhwc, ((0, 0), (1, 1), (1, 1), (0, 0)))
    w = jnp.transpose(w_oihw, (2, 3, 1, 0))        # (4, 4, C, Cout)
    w = _pad_axis(w, 3, Coutp).astype(jnp.bfloat16)
    b = _pad_axis(bias.reshape(1, Cout).astype(jnp.float32), 1, Coutp)
    sc = scale.reshape(1, C).astype(jnp.float32)
    sh = shift.reshape(1, C).astype(jnp.float32)

    kern = functools.partial(_bn_lrelu_conv_k4s1_kernel,
                             negative_slope=negative_slope)
    out = pl.pallas_call(
        kern,
        out_shape=jax.ShapeDtypeStruct((N, Ho, Wo, Coutp), out_dtype),
        grid_spec=pltpu.PrefetchScalarGridSpec(
            num_scalar_prefetch=0,
            grid=(N,),
            in_specs=[
                pl.BlockSpec((1, H + 2, W + 2, C), lambda n: (n, 0, 0, 0)),
                pl.BlockSpec((4, 4, C, Coutp), lambda n: (0, 0, 0, 0)),
                pl.BlockSpec((1, Coutp), lambda n: (0, 0)),
                pl.BlockSpec((1, C), lambda n: (0, 0)),
                pl.BlockSpec((1, C), lambda n: (0, 0)),
            ],
            out_specs=pl.BlockSpec((1, Ho, Wo, Coutp), lambda n: (n, 0, 0, 0)),
        ),
        compiler_params=pltpu.CompilerParams(
            dimension_semantics=("parallel",),
            vmem_limit_bytes=_VMEM_LIMIT,
        ),
    )(xp, w, b, sc, sh)
    return out[..., :Cout]


# ----------------------------------------------------------------------------
# Full forward pass
# ----------------------------------------------------------------------------
def patch_discriminator_forward(x_nchw, params):
    x = jnp.transpose(x_nchw, (0, 2, 3, 1))       # NCHW -> NHWC

    # conv1 + LeakyReLU(0.2) fused; bf16 activation (only feeds conv2's bf16 MXU).
    h1 = conv_k4s2(x, params["w1"], params["b1"],
                   negative_slope=0.2, out_dtype=jnp.bfloat16)

    # conv2 (bias only); BN batch statistics emitted from the f32 accumulator,
    # activation stored as bf16.
    h2, ch_sum, ch_sq = conv_k4s2(h1, params["w2"], params["b2"],
                                  negative_slope=None, out_dtype=jnp.bfloat16,
                                  emit_stats=True)

    # BatchNorm2d(128) training-mode batch stats (biased var, eps=1e-5), folded
    # into per-channel scale/shift from the fused one-pass sums.
    N, H2, W2, C = h2.shape
    cnt = N * H2 * W2
    mean = jnp.sum(ch_sum.reshape(N, C), axis=0) / cnt
    ex2 = jnp.sum(ch_sq.reshape(N, C), axis=0) / cnt
    var = jnp.maximum(ex2 - mean * mean, 0.0)
    inv_std = jax.lax.rsqrt(var + 1e-5)
    scale = params["gamma"] * inv_std
    shift = params["beta"] - mean * scale

    # BN + LeakyReLU(0.2) + conv3 fused; Cout=1 padded to 128 in-kernel for
    # lane-dense MXU columns / stores, real channel sliced out after.
    out = bn_lrelu_conv_k4s1(h2, params["w3"], params["b3"], scale, shift,
                             negative_slope=0.2, out_dtype=jnp.float32,
                             cout_pad=128)

    return jnp.transpose(out, (0, 3, 1, 2))       # NHWC -> NCHW


# ----------------------------------------------------------------------------
# Deterministic parameters + smoke test
# ----------------------------------------------------------------------------
def make_params(key, in_channels=6):
    ks = jax.random.split(key, 6)
    return {
        "w1": 0.05 * jax.random.normal(ks[0], (64, in_channels, 4, 4), jnp.float32),
        "b1": 0.05 * jax.random.normal(ks[1], (64,), jnp.float32),
        "w2": 0.05 * jax.random.normal(ks[2], (128, 64, 4, 4), jnp.float32),
        "b2": 0.05 * jax.random.normal(ks[3], (128,), jnp.float32),
        "gamma": jnp.ones((128,), jnp.float32),   # BatchNorm2d default weight
        "beta": jnp.zeros((128,), jnp.float32),   # BatchNorm2d default bias
        "w3": 0.05 * jax.random.normal(ks[4], (1, 128, 4, 4), jnp.float32),
        "b3": 0.05 * jax.random.normal(ks[5], (1,), jnp.float32),
    }


if __name__ == "__main__":
    key = jax.random.PRNGKey(0)
    pkey, xkey = jax.random.split(key)
    in_channels = 6
    params = make_params(pkey, in_channels)

    # small input consistent with the module: batch=2, C=6, 16x16 spatial
    x = jax.random.normal(xkey, (2, in_channels, 16, 16), jnp.float32)

    fwd = jax.jit(patch_discriminator_forward)
    out = fwd(x, params)
    out = jax.block_until_ready(out)

    # 16 -> 8 -> 4 -> 3 spatial; final channels = 1  =>  (2, 1, 3, 3)
    assert out.shape == (2, 1, 3, 3), out.shape
    assert jnp.isfinite(out).all()
    print("KERNEL_OK")
</pallas_src>

<mosaic_0001>
module attributes {stable_mosaic.version = 11 : i64} {
  func.func @_conv_k2s1_kernel(%arg0: i32, %arg1: memref<1x9x9x24xbf16, #tpu.memory_space<vmem>>, %arg2: memref<2x2x24x64xbf16, #tpu.memory_space<vmem>>, %arg3: memref<1x64xf32, #tpu.memory_space<vmem>>, %arg4: memref<1x8x8x64xbf16, #tpu.memory_space<vmem>>) attributes {dimension_semantics = [#tpu.dimension_semantics<parallel>], iteration_bounds = array<i64: 2>, scalar_prefetch = 0 : i64, scratch_operands = 0 : i64, tpu.core_type = #tpu.core_type<tc>, window_params = [{transform_indices = @transform_0, window_bounds = array<i64: 1, 9, 9, 24>}, {pipeline_mode = #tpu.pipeline_mode<synchronous>, transform_indices = @transform_1, window_bounds = array<i64: 2, 2, 24, 64>}, {pipeline_mode = #tpu.pipeline_mode<synchronous>, transform_indices = @transform_2, window_bounds = array<i64: 1, 64>}, {transform_indices = @transform_3, window_bounds = array<i64: 1, 8, 8, 64>}]} {
    %c0 = arith.constant 0 : index
    %c0_0 = arith.constant 0 : index
    %c0_1 = arith.constant 0 : index
    %c0_2 = arith.constant 0 : index
    %0 = vector.load %arg1[%c0, %c0_0, %c0_1, %c0_2] : memref<1x9x9x24xbf16, #tpu.memory_space<vmem>>, vector<1x9x9x24xbf16>
    %1 = vector.shape_cast %0 : vector<1x9x9x24xbf16> to vector<9x9x24xbf16>
    %cst = arith.constant 0.000000e+00 : f32
    %2 = vector.broadcast %cst : f32 to vector<64x64xf32>
    %3 = vector.extract_strided_slice %1 {offsets = [0, 0, 0], sizes = [8, 8, 24], strides = [1, 1, 1]} : vector<9x9x24xbf16> to vector<8x8x24xbf16>
    %4 = vector.shape_cast %3 : vector<8x8x24xbf16> to vector<64x24xbf16>
    %c0_3 = arith.constant 0 : index
    %c0_4 = arith.constant 0 : index
    %c0_5 = arith.constant 0 : index
    %c0_6 = arith.constant 0 : index
    %5 = vector.load %arg2[%c0_3, %c0_4, %c0_5, %c0_6] : memref<2x2x24x64xbf16, #tpu.memory_space<vmem>>, vector<1x1x24x64xbf16>
    %6 = vector.shape_cast %5 : vector<1x1x24x64xbf16> to vector<24x64xbf16>
    %cst_7 = arith.constant dense<0.000000e+00> : vector<64x64xf32>
    %7 = tpu.matmul %4, %6, %cst_7 {dimension_numbers = #tpu.dot_dimension_numbers<[1], [0], [0], [1], [0, 0, 1, 1], [], []>} : vector<64x24xbf16>, vector<24x64xbf16>, vector<64x64xf32> -> vector<64x64xf32>
    %8 = arith.addf %2, %7 : vector<64x64xf32>
    %9 = vector.extract_strided_slice %1 {offsets = [0, 1, 0], sizes = [8, 8, 24], strides = [1, 1, 1]} : vector<9x9x24xbf16> to vector<8x8x24xbf16>
    %10 = vector.shape_cast %9 : vector<8x8x24xbf16> to vector<64x24xbf16>
    %c0_8 = arith.constant 0 : index
    %c1 = arith.constant 1 : index
    %c0_9 = arith.constant 0 : index
    %c0_10 = arith.constant 0 : index
    %11 = vector.load %arg2[%c0_8, %c1, %c0_9, %c0_10] : memref<2x2x24x64xbf16, #tpu.memory_space<vmem>>, vector<1x1x24x64xbf16>
    %12 = vector.shape_cast %11 : vector<1x1x24x64xbf16> to vector<24x64xbf16>
    %cst_11 = arith.constant dense<0.000000e+00> : vector<64x64xf32>
    %13 = tpu.matmul %10, %12, %cst_11 {dimension_numbers = #tpu.dot_dimension_numbers<[1], [0], [0], [1], [0, 0, 1, 1], [], []>} : vector<64x24xbf16>, vector<24x64xbf16>, vector<64x64xf32> -> vector<64x64xf32>
    %14 = arith.addf %8, %13 : vector<64x64xf32>
    %15 = vector.extract_strided_slice %1 {offsets = [1, 0, 0], sizes = [8, 8, 24], strides = [1, 1, 1]} : vector<9x9x24xbf16> to vector<8x8x24xbf16>
    %16 = vector.shape_cast %15 : vector<8x8x24xbf16> to vector<64x24xbf16>
    %c1_12 = arith.constant 1 : index
    %c0_13 = arith.constant 0 : index
    %c0_14 = arith.constant 0 : index
    %c0_15 = arith.constant 0 : index
    %17 = vector.load %arg2[%c1_12, %c0_13, %c0_14, %c0_15] : memref<2x2x24x64xbf16, #tpu.memory_space<vmem>>, vector<1x1x24x64xbf16>
    %18 = vector.shape_cast %17 : vector<1x1x24x64xbf16> to vector<24x64xbf16>
    %cst_16 = arith.constant dense<0.000000e+00> : vector<64x64xf32>
    %19 = tpu.matmul %16, %18, %cst_16 {dimension_numbers = #tpu.dot_dimension_numbers<[1], [0], [0], [1], [0, 0, 1, 1], [], []>} : vector<64x24xbf16>, vector<24x64xbf16>, vector<64x64xf32> -> vector<64x64xf32>
    %20 = arith.addf %14, %19 : vector<64x64xf32>
    %21 = vector.extract_strided_slice %1 {offsets = [1, 1, 0], sizes = [8, 8, 24], strides = [1, 1, 1]} : vector<9x9x24xbf16> to vector<8x8x24xbf16>
    %22 = vector.shape_cast %21 : vector<8x8x24xbf16> to vector<64x24xbf16>
    %c1_17 = arith.constant 1 : index
    %c1_18 = arith.constant 1 : index
    %c0_19 = arith.constant 0 : index
    %c0_20 = arith.constant 0 : index
    %23 = vector.load %arg2[%c1_17, %c1_18, %c0_19, %c0_20] : memref<2x2x24x64xbf16, #tpu.memory_space<vmem>>, vector<1x1x24x64xbf16>
    %24 = vector.shape_cast %23 : vector<1x1x24x64xbf16> to vector<24x64xbf16>
    %cst_21 = arith.constant dense<0.000000e+00> : vector<64x64xf32>
    %25 = tpu.matmul %22, %24, %cst_21 {dimension_numbers = #tpu.dot_dimension_numbers<[1], [0], [0], [1], [0, 0, 1, 1], [], []>} : vector<64x24xbf16>, vector<24x64xbf16>, vector<64x64xf32> -> vector<64x64xf32>
    %26 = arith.addf %20, %25 : vector<64x64xf32>
    %c0_22 = arith.constant 0 : index
    %c0_23 = arith.constant 0 : index
    %27 = vector.load %arg3[%c0_22, %c0_23] : memref<1x64xf32, #tpu.memory_space<vmem>>, vector<1x64xf32>
    %28 = vector.broadcast %27 : vector<1x64xf32> to vector<64x64xf32>
    %29 = arith.addf %26, %28 : vector<64x64xf32>
    %cst_24 = arith.constant 0.000000e+00 : f32
    %30 = vector.broadcast %cst_24 : f32 to vector<64x64xf32>
    %31 = arith.cmpf oge, %29, %30 : vector<64x64xf32>
    %cst_25 = arith.constant 2.000000e-01 : f32
    %32 = vector.broadcast %cst_25 : f32 to vector<64x64xf32>
    %33 = arith.mulf %32, %29 : vector<64x64xf32>
    %34 = arith.select %31, %29, %33 : vector<64x64xi1>, vector<64x64xf32>
    %35 = vector.shape_cast %34 : vector<64x64xf32> to vector<1x8x8x64xf32>
    %36 = arith.truncf %35 : vector<1x8x8x64xf32> to vector<1x8x8x64xbf16>
    %c0_26 = arith.constant 0 : index
    %c0_27 = arith.constant 0 : index
    %c0_28 = arith.constant 0 : index
    %c0_29 = arith.constant 0 : index
    %37 = vector.load %arg4[%c0_26, %c0_27, %c0_28, %c0_29] : memref<1x8x8x64xbf16, #tpu.memory_space<vmem>>, vector<1x8x8x64xbf16>
    tpu.vector_store %arg4[%c0_26, %c0_27, %c0_28, %c0_29], %36 {strides = array<i32>} : memref<1x8x8x64xbf16, #tpu.memory_space<vmem>>, vector<1x8x8x64xbf16>,
    return
  }
  func.func @transform_0(%arg0: i32) -> (i32, i32, i32, i32) {
    %c0_i32 = arith.constant 0 : i32
    %c0_i32_0 = arith.constant 0 : i32
    %c0_i32_1 = arith.constant 0 : i32
    %c0_i32_2 = arith.constant 0 : i32
    return %arg0, %c0_i32, %c0_i32_0, %c0_i32_1 : i32, i32, i32, i32
  }
  func.func @transform_1(%arg0: i32) -> (i32, i32, i32, i32) {
    %c0_i32 = arith.constant 0 : i32
    %c0_i32_0 = arith.constant 0 : i32
    %c0_i32_1 = arith.constant 0 : i32
    %c0_i32_2 = arith.constant 0 : i32
    %c0_i32_3 = arith.constant 0 : i32
    return %c0_i32, %c0_i32_0, %c0_i32_1, %c0_i32_2 : i32, i32, i32, i32
  }
  func.func @transform_2(%arg0: i32) -> (i32, i32) {
    %c0_i32 = arith.constant 0 : i32
    %c0_i32_0 = arith.constant 0 : i32
    %c0_i32_1 = arith.constant 0 : i32
    return %c0_i32, %c0_i32_0 : i32, i32
  }
  func.func @transform_3(%arg0: i32) -> (i32, i32, i32, i32) {
    %c0_i32 = arith.constant 0 : i32
    %c0_i32_0 = arith.constant 0 : i32
    %c0_i32_1 = arith.constant 0 : i32
    %c0_i32_2 = arith.constant 0 : i32
    return %arg0, %c0_i32, %c0_i32_0, %c0_i32_1 : i32, i32, i32, i32
  }
}

module attributes {stable_mosaic.version = 11 : i64} {
  func.func @_conv_k2s1_kernel(%arg0: i32, %arg1: memref<1x5x5x256xbf16, #tpu.memory_space<vmem>>, %arg2: memref<2x2x256x128xbf16, #tpu.memory_space<vmem>>, %arg3: memref<1x128xf32, #tpu.memory_space<vmem>>, %arg4: memref<1x4x4x128xbf16, #tpu.memory_space<vmem>>, %arg5: memref<1x1x128xf32, #tpu.memory_space<vmem>>, %arg6: memref<1x1x128xf32, #tpu.memory_space<vmem>>) attributes {dimension_semantics = [#tpu.dimension_semantics<parallel>], iteration_bounds = array<i64: 2>, scalar_prefetch = 0 : i64, scratch_operands = 0 : i64, tpu.core_type = #tpu.core_type<tc>, window_params = [{transform_indices = @transform_0, window_bounds = array<i64: 1, 5, 5, 256>}, {pipeline_mode = #tpu.pipeline_mode<synchronous>, transform_indices = @transform_1, window_bounds = array<i64: 2, 2, 256, 128>}, {pipeline_mode = #tpu.pipeline_mode<synchronous>, transform_indices = @transform_2, window_bounds = array<i64: 1, 128>}, {transform_indices = @transform_3, window_bounds = array<i64: 1, 4, 4, 128>}, {transform_indices = @transform_4, window_bounds = array<i64: 1, 1, 128>}, {transform_indices = @transform_5, window_bounds = array<i64: 1, 1, 128>}]} {
    %c0 = arith.constant 0 : index
    %c0_0 = arith.constant 0 : index
    %c0_1 = arith.constant 0 : index
    %c0_2 = arith.constant 0 : index
    %0 = vector.load %arg1[%c0, %c0_0, %c0_1, %c0_2] : memref<1x5x5x256xbf16, #tpu.memory_space<vmem>>, vector<1x5x5x256xbf16>
    %1 = vector.shape_cast %0 : vector<1x5x5x256xbf16> to vector<5x5x256xbf16>
    %cst = arith.constant 0.000000e+00 : f32
    %2 = vector.broadcast %cst : f32 to vector<16x128xf32>
    %3 = vector.extract_strided_slice %1 {offsets = [0, 0, 0], sizes = [4, 4, 256], strides = [1, 1, 1]} : vector<5x5x256xbf16> to vector<4x4x256xbf16>
    %4 = vector.shape_cast %3 : vector<4x4x256xbf16> to vector<16x256xbf16>
    %c0_3 = arith.constant 0 : index
    %c0_4 = arith.constant 0 : index
    %c0_5 = arith.constant 0 : index
    %c0_6 = arith.constant 0 : index
    %5 = vector.load %arg2[%c0_3, %c0_4, %c0_5, %c0_6] : memref<2x2x256x128xbf16, #tpu.memory_space<vmem>>, vector<1x1x256x128xbf16>
    %6 = vector.shape_cast %5 : vector<1x1x256x128xbf16> to vector<256x128xbf16>
    %cst_7 = arith.constant dense<0.000000e+00> : vector<16x128xf32>
    %7 = tpu.matmul %4, %6, %cst_7 {dimension_numbers = #tpu.dot_dimension_numbers<[1], [0], [0], [1], [0, 0, 1, 1], [], []>} : vector<16x256xbf16>, vector<256x128xbf16>, vector<16x128xf32> -> vector<16x128xf32>
    %8 = arith.addf %2, %7 : vector<16x128xf32>
    %9 = vector.extract_strided_slice %1 {offsets = [0, 1, 0], sizes = [4, 4, 256], strides = [1, 1, 1]} : vector<5x5x256xbf16> to vector<4x4x256xbf16>
    %10 = vector.shape_cast %9 : vector<4x4x256xbf16> to vector<16x256xbf16>
    %c0_8 = arith.constant 0 : index
    %c1 = arith.constant 1 : index
    %c0_9 = arith.constant 0 : index
    %c0_10 = arith.constant 0 : index
    %11 = vector.load %arg2[%c0_8, %c1, %c0_9, %c0_10] : memref<2x2x256x128xbf16, #tpu.memory_space<vmem>>, vector<1x1x256x128xbf16>
    %12 = vector.shape_cast %11 : vector<1x1x256x128xbf16> to vector<256x128xbf16>
    %cst_11 = arith.constant dense<0.000000e+00> : vector<16x128xf32>
    %13 = tpu.matmul %10, %12, %cst_11 {dimension_numbers = #tpu.dot_dimension_numbers<[1], [0], [0], [1], [0, 0, 1, 1], [], []>} : vector<16x256xbf16>, vector<256x128xbf16>, vector<16x128xf32> -> vector<16x128xf32>
    %14 = arith.addf %8, %13 : vector<16x128xf32>
    %15 = vector.extract_strided_slice %1 {offsets = [1, 0, 0], sizes = [4, 4, 256], strides = [1, 1, 1]} : vector<5x5x256xbf16> to vector<4x4x256xbf16>
    %16 = vector.shape_cast %15 : vector<4x4x256xbf16> to vector<16x256xbf16>
    %c1_12 = arith.constant 1 : index
    %c0_13 = arith.constant 0 : index
    %c0_14 = arith.constant 0 : index
    %c0_15 = arith.constant 0 : index
    %17 = vector.load %arg2[%c1_12, %c0_13, %c0_14, %c0_15] : memref<2x2x256x128xbf16, #tpu.memory_space<vmem>>, vector<1x1x256x128xbf16>
    %18 = vector.shape_cast %17 : vector<1x1x256x128xbf16> to vector<256x128xbf16>
    %cst_16 = arith.constant dense<0.000000e+00> : vector<16x128xf32>
    %19 = tpu.matmul %16, %18, %cst_16 {dimension_numbers = #tpu.dot_dimension_numbers<[1], [0], [0], [1], [0, 0, 1, 1], [], []>} : vector<16x256xbf16>, vector<256x128xbf16>, vector<16x128xf32> -> vector<16x128xf32>
    %20 = arith.addf %14, %19 : vector<16x128xf32>
    %21 = vector.extract_strided_slice %1 {offsets = [1, 1, 0], sizes = [4, 4, 256], strides = [1, 1, 1]} : vector<5x5x256xbf16> to vector<4x4x256xbf16>
    %22 = vector.shape_cast %21 : vector<4x4x256xbf16> to vector<16x256xbf16>
    %c1_17 = arith.constant 1 : index
    %c1_18 = arith.constant 1 : index
    %c0_19 = arith.constant 0 : index
    %c0_20 = arith.constant 0 : index
    %23 = vector.load %arg2[%c1_17, %c1_18, %c0_19, %c0_20] : memref<2x2x256x128xbf16, #tpu.memory_space<vmem>>, vector<1x1x256x128xbf16>
    %24 = vector.shape_cast %23 : vector<1x1x256x128xbf16> to vector<256x128xbf16>
    %cst_21 = arith.constant dense<0.000000e+00> : vector<16x128xf32>
    %25 = tpu.matmul %22, %24, %cst_21 {dimension_numbers = #tpu.dot_dimension_numbers<[1], [0], [0], [1], [0, 0, 1, 1], [], []>} : vector<16x256xbf16>, vector<256x128xbf16>, vector<16x128xf32> -> vector<16x128xf32>
    %26 = arith.addf %20, %25 : vector<16x128xf32>
    %c0_22 = arith.constant 0 : index
    %c0_23 = arith.constant 0 : index
    %27 = vector.load %arg3[%c0_22, %c0_23] : memref<1x128xf32, #tpu.memory_space<vmem>>, vector<1x128xf32>
    %28 = vector.broadcast %27 : vector<1x128xf32> to vector<16x128xf32>
    %29 = arith.addf %26, %28 : vector<16x128xf32>
    %cst_24 = arith.constant dense<0.000000e+00> : vector<128xf32>
    %30 = vector.multi_reduction <add>, %29, %cst_24 [0] : vector<16x128xf32> to vector<128xf32>
    %31 = vector.shape_cast %30 : vector<128xf32> to vector<1x128xf32>
    %32 = vector.shape_cast %31 : vector<1x128xf32> to vector<1x1x128xf32>
    %c0_25 = arith.constant 0 : index
    %c0_26 = arith.constant 0 : index
    %c0_27 = arith.constant 0 : index
    %33 = vector.load %arg5[%c0_25, %c0_26, %c0_27] : memref<1x1x128xf32, #tpu.memory_space<vmem>>, vector<1x1x128xf32>
    tpu.vector_store %arg5[%c0_25, %c0_26, %c0_27], %32 {strides = array<i32>} : memref<1x1x128xf32, #tpu.memory_space<vmem>>, vector<1x1x128xf32>,
    %34 = arith.mulf %29, %29 : vector<16x128xf32>
    %cst_28 = arith.constant dense<0.000000e+00> : vector<128xf32>
    %35 = vector.multi_reduction <add>, %34, %cst_28 [0] : vector<16x128xf32> to vector<128xf32>
    %36 = vector.shape_cast %35 : vector<128xf32> to vector<1x128xf32>
    %37 = vector.shape_cast %36 : vector<1x128xf32> to vector<1x1x128xf32>
    %c0_29 = arith.constant 0 : index
    %c0_30 = arith.constant 0 : index
    %c0_31 = arith.constant 0 : index
    %38 = vector.load %arg6[%c0_29, %c0_30, %c0_31] : memref<1x1x128xf32, #tpu.memory_space<vmem>>, vector<1x1x128xf32>
    tpu.vector_store %arg6[%c0_29, %c0_30, %c0_31], %37 {strides = array<i32>} : memref<1x1x128xf32, #tpu.memory_space<vmem>>, vector<1x1x128xf32>,
    %39 = vector.shape_cast %29 : vector<16x128xf32> to vector<1x4x4x128xf32>
    %40 = arith.truncf %39 : vector<1x4x4x128xf32> to vector<1x4x4x128xbf16>
    %c0_32 = arith.constant 0 : index
    %c0_33 = arith.constant 0 : index
    %c0_34 = arith.constant 0 : index
    %c0_35 = arith.constant 0 : index
    %41 = vector.load %arg4[%c0_32, %c0_33, %c0_34, %c0_35] : memref<1x4x4x128xbf16, #tpu.memory_space<vmem>>, vector<1x4x4x128xbf16>
    tpu.vector_store %arg4[%c0_32, %c0_33, %c0_34, %c0_35], %40 {strides = array<i32>} : memref<1x4x4x128xbf16, #tpu.memory_space<vmem>>, vector<1x4x4x128xbf16>,
    return
  }
  func.func @transform_0(%arg0: i32) -> (i32, i32, i32, i32) {
    %c0_i32 = arith.constant 0 : i32
    %c0_i32_0 = arith.constant 0 : i32
    %c0_i32_1 = arith.constant 0 : i32
    %c0_i32_2 = arith.constant 0 : i32
    return %arg0, %c0_i32, %c0_i32_0, %c0_i32_1 : i32, i32, i32, i32
  }
  func.func @transform_1(%arg0: i32) -> (i32, i32, i32, i32) {
    %c0_i32 = arith.constant 0 : i32
    %c0_i32_0 = arith.constant 0 : i32
    %c0_i32_1 = arith.constant 0 : i32
    %c0_i32_2 = arith.constant 0 : i32
    %c0_i32_3 = arith.constant 0 : i32
    return %c0_i32, %c0_i32_0, %c0_i32_1, %c0_i32_2 : i32, i32, i32, i32
  }
  func.func @transform_2(%arg0: i32) -> (i32, i32) {
    %c0_i32 = arith.constant 0 : i32
    %c0_i32_0 = arith.constant 0 : i32
    %c0_i32_1 = arith.constant 0 : i32
    return %c0_i32, %c0_i32_0 : i32, i32
  }
  func.func @transform_3(%arg0: i32) -> (i32, i32, i32, i32) {
    %c0_i32 = arith.constant 0 : i32
    %c0_i32_0 = arith.constant 0 : i32
    %c0_i32_1 = arith.constant 0 : i32
    %c0_i32_2 = arith.constant 0 : i32
    return %arg0, %c0_i32, %c0_i32_0, %c0_i32_1 : i32, i32, i32, i32
  }
  func.func @transform_4(%arg0: i32) -> (i32, i32, i32) {
    %c0_i32 = arith.constant 0 : i32
    %c0_i32_0 = arith.constant 0 : i32
    %c0_i32_1 = arith.constant 0 : i32
    return %arg0, %c0_i32, %c0_i32_0 : i32, i32, i32
  }
  func.func @transform_5(%arg0: i32) -> (i32, i32, i32) {
    %c0_i32 = arith.constant 0 : i32
    %c0_i32_0 = arith.constant 0 : i32
    %c0_i32_1 = arith.constant 0 : i32
    return %arg0, %c0_i32, %c0_i32_0 : i32, i32, i32
  }
}

module attributes {stable_mosaic.version = 11 : i64} {
  func.func @_bn_lrelu_conv_k4s1_kernel(%arg0: i32, %arg1: memref<1x6x6x128xbf16, #tpu.memory_space<vmem>>, %arg2: memref<4x4x128x128xbf16, #tpu.memory_space<vmem>>, %arg3: memref<1x128xf32, #tpu.memory_space<vmem>>, %arg4: memref<1x128xf32, #tpu.memory_space<vmem>>, %arg5: memref<1x128xf32, #tpu.memory_space<vmem>>, %arg6: memref<1x3x3x128xf32, #tpu.memory_space<vmem>>) attributes {dimension_semantics = [#tpu.dimension_semantics<parallel>], iteration_bounds = array<i64: 2>, scalar_prefetch = 0 : i64, scratch_operands = 0 : i64, tpu.core_type = #tpu.core_type<tc>, window_params = [{transform_indices = @transform_0, window_bounds = array<i64: 1, 6, 6, 128>}, {pipeline_mode = #tpu.pipeline_mode<synchronous>, transform_indices = @transform_1, window_bounds = array<i64: 4, 4, 128, 128>}, {pipeline_mode = #tpu.pipeline_mode<synchronous>, transform_indices = @transform_2, window_bounds = array<i64: 1, 128>}, {pipeline_mode = #tpu.pipeline_mode<synchronous>, transform_indices = @transform_3, window_bounds = array<i64: 1, 128>}, {pipeline_mode = #tpu.pipeline_mode<synchronous>, transform_indices = @transform_4, window_bounds = array<i64: 1, 128>}, {transform_indices = @transform_5, window_bounds = array<i64: 1, 3, 3, 128>}]} {
    %c0 = arith.constant 0 : index
    %c0_0 = arith.constant 0 : index
    %c0_1 = arith.constant 0 : index
    %c0_2 = arith.constant 0 : index
    %0 = vector.load %arg1[%c0, %c0_0, %c0_1, %c0_2] : memref<1x6x6x128xbf16, #tpu.memory_space<vmem>>, vector<1x6x6x128xbf16>
    %1 = vector.shape_cast %0 : vector<1x6x6x128xbf16> to vector<6x6x128xbf16>
    %2 = arith.extf %1 : vector<6x6x128xbf16> to vector<6x6x128xf32>
    %c0_3 = arith.constant 0 : index
    %c0_4 = arith.constant 0 : index
    %3 = vector.load %arg4[%c0_3, %c0_4] : memref<1x128xf32, #tpu.memory_space<vmem>>, vector<1x128xf32>
    %4 = vector.shape_cast %3 : vector<1x128xf32> to vector<1x1x128xf32>
    %5 = vector.broadcast %4 : vector<1x1x128xf32> to vector<6x6x128xf32>
    %6 = arith.mulf %2, %5 : vector<6x6x128xf32>
    %c0_5 = arith.constant 0 : index
    %c0_6 = arith.constant 0 : index
    %7 = vector.load %arg5[%c0_5, %c0_6] : memref<1x128xf32, #tpu.memory_space<vmem>>, vector<1x128xf32>
    %8 = vector.shape_cast %7 : vector<1x128xf32> to vector<1x1x128xf32>
    %9 = vector.broadcast %8 : vector<1x1x128xf32> to vector<6x6x128xf32>
    %10 = arith.addf %6, %9 : vector<6x6x128xf32>
    %cst = arith.constant 0.000000e+00 : f32
    %11 = vector.broadcast %cst : f32 to vector<6x6x128xf32>
    %12 = arith.cmpf oge, %10, %11 : vector<6x6x128xf32>
    %cst_7 = arith.constant 2.000000e-01 : f32
    %13 = vector.broadcast %cst_7 : f32 to vector<6x6x128xf32>
    %14 = arith.mulf %13, %10 : vector<6x6x128xf32>
    %15 = arith.select %12, %10, %14 : vector<6x6x128xi1>, vector<6x6x128xf32>
    %16 = tpu.iota {dimensions = array<i32: 0>} : vector<6x6x1xi32>
    %17 = tpu.iota {dimensions = array<i32: 1>} : vector<6x6x1xi32>
    %c1_i32 = arith.constant 1 : i32
    %18 = vector.broadcast %c1_i32 : i32 to vector<6x6x1xi32>
    %19 = arith.cmpi sge, %16, %18 : vector<6x6x1xi32>
    %c5_i32 = arith.constant 5 : i32
    %20 = vector.broadcast %c5_i32 : i32 to vector<6x6x1xi32>
    %21 = arith.cmpi slt, %16, %20 : vector<6x6x1xi32>
    %22 = arith.andi %19, %21 : vector<6x6x1xi1>
    %c1_i32_8 = arith.constant 1 : i32
    %23 = vector.broadcast %c1_i32_8 : i32 to vector<6x6x1xi32>
    %24 = arith.cmpi sge, %17, %23 : vector<6x6x1xi32>
    %25 = arith.andi %22, %24 : vector<6x6x1xi1>
    %c5_i32_9 = arith.constant 5 : i32
    %26 = vector.broadcast %c5_i32_9 : i32 to vector<6x6x1xi32>
    %27 = arith.cmpi slt, %17, %26 : vector<6x6x1xi32>
    %28 = arith.andi %25, %27 : vector<6x6x1xi1>
    %cst_10 = arith.constant 0.000000e+00 : f32
    %29 = vector.shape_cast %28 : vector<6x6x1xi1> to vector<6x6x1xi1>
    %30 = vector.broadcast %29 : vector<6x6x1xi1> to vector<6x6x128xi1>
    %31 = vector.broadcast %cst_10 : f32 to vector<6x6x128xf32>
    %32 = arith.select %30, %15, %31 : vector<6x6x128xi1>, vector<6x6x128xf32>
    %33 = arith.truncf %32 : vector<6x6x128xf32> to vector<6x6x128xbf16>
    %cst_11 = arith.constant 0.000000e+00 : f32
    %34 = vector.broadcast %cst_11 : f32 to vector<9x128xf32>
    %35 = vector.extract_strided_slice %33 {offsets = [0, 0, 0], sizes = [3, 3, 128], strides = [1, 1, 1]} : vector<6x6x128xbf16> to vector<3x3x128xbf16>
    %36 = vector.shape_cast %35 : vector<3x3x128xbf16> to vector<9x128xbf16>
    %c0_12 = arith.constant 0 : index
    %c0_13 = arith.constant 0 : index
    %c0_14 = arith.constant 0 : index
    %c0_15 = arith.constant 0 : index
    %37 = vector.load %arg2[%c0_12, %c0_13, %c0_14, %c0_15] : memref<4x4x128x128xbf16, #tpu.memory_space<vmem>>, vector<1x1x128x128xbf16>
    %38 = vector.shape_cast %37 : vector<1x1x128x128xbf16> to vector<128x128xbf16>
    %cst_16 = arith.constant dense<0.000000e+00> : vector<9x128xf32>
    %39 = tpu.matmul %36, %38, %cst_16 {dimension_numbers = #tpu.dot_dimension_numbers<[1], [0], [0], [1], [0, 0, 1, 1], [], []>} : vector<9x128xbf16>, vector<128x128xbf16>, vector<9x128xf32> -> vector<9x128xf32>
    %40 = arith.addf %34, %39 : vector<9x128xf32>
    %41 = vector.extract_strided_slice %33 {offsets = [0, 1, 0], sizes = [3, 3, 128], strides = [1, 1, 1]} : vector<6x6x128xbf16> to vector<3x3x128xbf16>
    %42 = vector.shape_cast %41 : vector<3x3x128xbf16> to vector<9x128xbf16>
    %c0_17 = arith.constant 0 : index
    %c1 = arith.constant 1 : index
    %c0_18 = arith.constant 0 : index
    %c0_19 = arith.constant 0 : index
    %43 = vector.load %arg2[%c0_17, %c1, %c0_18, %c0_19] : memref<4x4x128x128xbf16, #tpu.memory_space<vmem>>, vector<1x1x128x128xbf16>
    %44 = vector.shape_cast %43 : vector<1x1x128x128xbf16> to vector<128x128xbf16>
    %cst_20 = arith.constant dense<0.000000e+00> : vector<9x128xf32>
    %45 = tpu.matmul %42, %44, %cst_20 {dimension_numbers = #tpu.dot_dimension_numbers<[1], [0], [0], [1], [0, 0, 1, 1], [], []>} : vector<9x128xbf16>, vector<128x128xbf16>, vector<9x128xf32> -> vector<9x128xf32>
    %46 = arith.addf %40, %45 : vector<9x128xf32>
    %47 = vector.extract_strided_slice %33 {offsets = [0, 2, 0], sizes = [3, 3, 128], strides = [1, 1, 1]} : vector<6x6x128xbf16> to vector<3x3x128xbf16>
    %48 = vector.shape_cast %47 : vector<3x3x128xbf16> to vector<9x128xbf16>
    %c0_21 = arith.constant 0 : index
    %c2 = arith.constant 2 : index
    %c0_22 = arith.constant 0 : index
    %c0_23 = arith.constant 0 : index
    %49 = vector.load %arg2[%c0_21, %c2, %c0_22, %c0_23] : memref<4x4x128x128xbf16, #tpu.memory_space<vmem>>, vector<1x1x128x128xbf16>
    %50 = vector.shape_cast %49 : vector<1x1x128x128xbf16> to vector<128x128xbf16>
    %cst_24 = arith.constant dense<0.000000e+00> : vector<9x128xf32>
    %51 = tpu.matmul %48, %50, %cst_24 {dimension_numbers = #tpu.dot_dimension_numbers<[1], [0], [0], [1], [0, 0, 1, 1], [], []>} : vector<9x128xbf16>, vector<128x128xbf16>, vector<9x128xf32> -> vector<9x128xf32>
    %52 = arith.addf %46, %51 : vector<9x128xf32>
    %53 = vector.extract_strided_slice %33 {offsets = [0, 3, 0], sizes = [3, 3, 128], strides = [1, 1, 1]} : vector<6x6x128xbf16> to vector<3x3x128xbf16>
    %54 = vector.shape_cast %53 : vector<3x3x128xbf16> to vector<9x128xbf16>
    %c0_25 = arith.constant 0 : index
    %c3 = arith.constant 3 : index
    %c0_26 = arith.constant 0 : index
    %c0_27 = arith.constant 0 : index
    %55 = vector.load %arg2[%c0_25, %c3, %c0_26, %c0_27] : memref<4x4x128x128xbf16, #tpu.memory_space<vmem>>, vector<1x1x128x128xbf16>
    %56 = vector.shape_cast %55 : vector<1x1x128x128xbf16> to vector<128x128xbf16>
    %cst_28 = arith.constant dense<0.000000e+00> : vector<9x128xf32>
    %57 = tpu.matmul %54, %56, %cst_28 {dimension_numbers = #tpu.dot_dimension_numbers<[1], [0], [0], [1], [0, 0, 1, 1], [], []>} : vector<9x128xbf16>, vector<128x128xbf16>, vector<9x128xf32> -> vector<9x128xf32>
    %58 = arith.addf %52, %57 : vector<9x128xf32>
    %59 = vector.extract_strided_slice %33 {offsets = [1, 0, 0], sizes = [3, 3, 128], strides = [1, 1, 1]} : vector<6x6x128xbf16> to vector<3x3x128xbf16>
    %60 = vector.shape_cast %59 : vector<3x3x128xbf16> to vector<9x128xbf16>
    %c1_29 = arith.constant 1 : index
    %c0_30 = arith.constant 0 : index
    %c0_31 = arith.constant 0 : index
    %c0_32 = arith.constant 0 : index
    %61 = vector.load %arg2[%c1_29, %c0_30, %c0_31, %c0_32] : memref<4x4x128x128xbf16, #tpu.memory_space<vmem>>, vector<1x1x128x128xbf16>
    %62 = vector.shape_cast %61 : vector<1x1x128x128xbf16> to vector<128x128xbf16>
    %cst_33 = arith.constant dense<0.000000e+00> : vector<9x128xf32>
    %63 = tpu.matmul %60, %62, %cst_33 {dimension_numbers = #tpu.dot_dimension_numbers<[1], [0], [0], [1], [0, 0, 1, 1], [], []>} : vector<9x128xbf16>, vector<128x128xbf16>, vector<9x128xf32> -> vector<9x128xf32>
    %64 = arith.addf %58, %63 : vector<9x128xf32>
    %65 = vector.extract_strided_slice %33 {offsets = [1, 1, 0], sizes = [3, 3, 128], strides = [1, 1, 1]} : vector<6x6x128xbf16> to vector<3x3x128xbf16>
    %66 = vector.shape_cast %65 : vector<3x3x128xbf16> to vector<9x128xbf16>
    %c1_34 = arith.constant 1 : index
    %c1_35 = arith.constant 1 : index
    %c0_36 = arith.constant 0 : index
    %c0_37 = arith.constant 0 : index
    %67 = vector.load %arg2[%c1_34, %c1_35, %c0_36, %c0_37] : memref<4x4x128x128xbf16, #tpu.memory_space<vmem>>, vector<1x1x128x128xbf16>
    %68 = vector.shape_cast %67 : vector<1x1x128x128xbf16> to vector<128x128xbf16>
    %cst_38 = arith.constant dense<0.000000e+00> : vector<9x128xf32>
    %69 = tpu.matmul %66, %68, %cst_38 {dimension_numbers = #tpu.dot_dimension_numbers<[1], [0], [0], [1], [0, 0, 1, 1], [], []>} : vector<9x128xbf16>, vector<128x128xbf16>, vector<9x128xf32> -> vector<9x128xf32>
    %70 = arith.addf %64, %69 : vector<9x128xf32>
    %71 = vector.extract_strided_slice %33 {offsets = [1, 2, 0], sizes = [3, 3, 128], strides = [1, 1, 1]} : vector<6x6x128xbf16> to vector<3x3x128xbf16>
    %72 = vector.shape_cast %71 : vector<3x3x128xbf16> to vector<9x128xbf16>
    %c1_39 = arith.constant 1 : index
    %c2_40 = arith.constant 2 : index
    %c0_41 = arith.constant 0 : index
    %c0_42 = arith.constant 0 : index
    %73 = vector.load %arg2[%c1_39, %c2_40, %c0_41, %c0_42] : memref<4x4x128x128xbf16, #tpu.memory_space<vmem>>, vector<1x1x128x128xbf16>
    %74 = vector.shape_cast %73 : vector<1x1x128x128xbf16> to vector<128x128xbf16>
    %cst_43 = arith.constant dense<0.000000e+00> : vector<9x128xf32>
    %75 = tpu.matmul %72, %74, %cst_43 {dimension_numbers = #tpu.dot_dimension_numbers<[1], [0], [0], [1], [0, 0, 1, 1], [], []>} : vector<9x128xbf16>, vector<128x128xbf16>, vector<9x128xf32> -> vector<9x128xf32>
    %76 = arith.addf %70, %75 : vector<9x128xf32>
    %77 = vector.extract_strided_slice %33 {offsets = [1, 3, 0], sizes = [3, 3, 128], strides = [1, 1, 1]} : vector<6x6x128xbf16> to vector<3x3x128xbf16>
    %78 = vector.shape_cast %77 : vector<3x3x128xbf16> to vector<9x128xbf16>
    %c1_44 = arith.constant 1 : index
    %c3_45 = arith.constant 3 : index
    %c0_46 = arith.constant 0 : index
    %c0_47 = arith.constant 0 : index
    %79 = vector.load %arg2[%c1_44, %c3_45, %c0_46, %c0_47] : memref<4x4x128x128xbf16, #tpu.memory_space<vmem>>, vector<1x1x128x128xbf16>
    %80 = vector.shape_cast %79 : vector<1x1x128x128xbf16> to vector<128x128xbf16>
    %cst_48 = arith.constant dense<0.000000e+00> : vector<9x128xf32>
    %81 = tpu.matmul %78, %80, %cst_48 {dimension_numbers = #tpu.dot_dimension_numbers<[1], [0], [0], [1], [0, 0, 1, 1], [], []>} : vector<9x128xbf16>, vector<128x128xbf16>, vector<9x128xf32> -> vector<9x128xf32>
    %82 = arith.addf %76, %81 : vector<9x128xf32>
    %83 = vector.extract_strided_slice %33 {offsets = [2, 0, 0], sizes = [3, 3, 128], strides = [1, 1, 1]} : vector<6x6x128xbf16> to vector<3x3x128xbf16>
    %84 = vector.shape_cast %83 : vector<3x3x128xbf16> to vector<9x128xbf16>
    %c2_49 = arith.constant 2 : index
    %c0_50 = arith.constant 0 : index
    %c0_51 = arith.constant 0 : index
    %c0_52 = arith.constant 0 : index
    %85 = vector.load %arg2[%c2_49, %c0_50, %c0_51, %c0_52] : memref<4x4x128x128xbf16, #tpu.memory_space<vmem>>, vector<1x1x128x128xbf16>
    %86 = vector.shape_cast %85 : vector<1x1x128x128xbf16> to vector<128x128xbf16>
    %cst_53 = arith.constant dense<0.000000e+00> : vector<9x128xf32>
    %87 = tpu.matmul %84, %86, %cst_53 {dimension_numbers = #tpu.dot_dimension_numbers<[1], [0], [0], [1], [0, 0, 1, 1], [], []>} : vector<9x128xbf16>, vector<128x128xbf16>, vector<9x128xf32> -> vector<9x128xf32>
    %88 = arith.addf %82, %87 : vector<9x128xf32>
    %89 = vector.extract_strided_slice %33 {offsets = [2, 1, 0], sizes = [3, 3, 128], strides = [1, 1, 1]} : vector<6x6x128xbf16> to vector<3x3x128xbf16>
    %90 = vector.shape_cast %89 : vector<3x3x128xbf16> to vector<9x128xbf16>
    %c2_54 = arith.constant 2 : index
    %c1_55 = arith.constant 1 : index
    %c0_56 = arith.constant 0 : index
    %c0_57 = arith.constant 0 : index
    %91 = vector.load %arg2[%c2_54, %c1_55, %c0_56, %c0_57] : memref<4x4x128x128xbf16, #tpu.memory_space<vmem>>, vector<1x1x128x128xbf16>
    %92 = vector.shape_cast %91 : vector<1x1x128x128xbf16> to vector<128x128xbf16>
    %cst_58 = arith.constant dense<0.000000e+00> : vector<9x128xf32>
    %93 = tpu.matmul %90, %92, %cst_58 {dimension_numbers = #tpu.dot_dimension_numbers<[1], [0], [0], [1], [0, 0, 1, 1], [], []>} : vector<9x128xbf16>, vector<128x128xbf16>, vector<9x128xf32> -> vector<9x128xf32>
    %94 = arith.addf %88, %93 : vector<9x128xf32>
    %95 = vector.extract_strided_slice %33 {offsets = [2, 2, 0], sizes = [3, 3, 128], strides = [1, 1, 1]} : vector<6x6x128xbf16> to vector<3x3x128xbf16>
    %96 = vector.shape_cast %95 : vector<3x3x128xbf16> to vector<9x128xbf16>
    %c2_59 = arith.constant 2 : index
    %c2_60 = arith.constant 2 : index
    %c0_61 = arith.constant 0 : index
    %c0_62 = arith.constant 0 : index
    %97 = vector.load %arg2[%c2_59, %c2_60, %c0_61, %c0_62] : memref<4x4x128x128xbf16, #tpu.memory_space<vmem>>, vector<1x1x128x128xbf16>
    %98 = vector.shape_cast %97 : vector<1x1x128x128xbf16> to vector<128x128xbf16>
    %cst_63 = arith.constant dense<0.000000e+00> : vector<9x128xf32>
    %99 = tpu.matmul %96, %98, %cst_63 {dimension_numbers = #tpu.dot_dimension_numbers<[1], [0], [0], [1], [0, 0, 1, 1], [], []>} : vector<9x128xbf16>, vector<128x128xbf16>, vector<9x128xf32> -> vector<9x128xf32>
    %100 = arith.addf %94, %99 : vector<9x128xf32>
    %101 = vector.extract_strided_slice %33 {offsets = [2, 3, 0], sizes = [3, 3, 128], strides = [1, 1, 1]} : vector<6x6x128xbf16> to vector<3x3x128xbf16>
    %102 = vector.shape_cast %101 : vector<3x3x128xbf16> to vector<9x128xbf16>
    %c2_64 = arith.constant 2 : index
    %c3_65 = arith.constant 3 : index
    %c0_66 = arith.constant 0 : index
    %c0_67 = arith.constant 0 : index
    %103 = vector.load %arg2[%c2_64, %c3_65, %c0_66, %c0_67] : memref<4x4x128x128xbf16, #tpu.memory_space<vmem>>, vector<1x1x128x128xbf16>
    %104 = vector.shape_cast %103 : vector<1x1x128x128xbf16> to vector<128x128xbf16>
    %cst_68 = arith.constant dense<0.000000e+00> : vector<9x128xf32>
    %105 = tpu.matmul %102, %104, %cst_68 {dimension_numbers = #tpu.dot_dimension_numbers<[1], [0], [0], [1], [0, 0, 1, 1], [], []>} : vector<9x128xbf16>, vector<128x128xbf16>, vector<9x128xf32> -> vector<9x128xf32>
    %106 = arith.addf %100, %105 : vector<9x128xf32>
    %107 = vector.extract_strided_slice %33 {offsets = [3, 0, 0], sizes = [3, 3, 128], strides = [1, 1, 1]} : vector<6x6x128xbf16> to vector<3x3x128xbf16>
    %108 = vector.shape_cast %107 : vector<3x3x128xbf16> to vector<9x128xbf16>
    %c3_69 = arith.constant 3 : index
    %c0_70 = arith.constant 0 : index
    %c0_71 = arith.constant 0 : index
    %c0_72 = arith.constant 0 : index
    %109 = vector.load %arg2[%c3_69, %c0_70, %c0_71, %c0_72] : memref<4x4x128x128xbf16, #tpu.memory_space<vmem>>, vector<1x1x128x128xbf16>
    %110 = vector.shape_cast %109 : vector<1x1x128x128xbf16> to vector<128x128xbf16>
    %cst_73 = arith.constant dense<0.000000e+00> : vector<9x128xf32>
    %111 = tpu.matmul %108, %110, %cst_73 {dimension_numbers = #tpu.dot_dimension_numbers<[1], [0], [0], [1], [0, 0, 1, 1], [], []>} : vector<9x128xbf16>, vector<128x128xbf16>, vector<9x128xf32> -> vector<9x128xf32>
    %112 = arith.addf %106, %111 : vector<9x128xf32>
    %113 = vector.extract_strided_slice %33 {offsets = [3, 1, 0], sizes = [3, 3, 128], strides = [1, 1, 1]} : vector<6x6x128xbf16> to vector<3x3x128xbf16>
    %114 = vector.shape_cast %113 : vector<3x3x128xbf16> to vector<9x128xbf16>
    %c3_74 = arith.constant 3 : index
    %c1_75 = arith.constant 1 : index
    %c0_76 = arith.constant 0 : index
    %c0_77 = arith.constant 0 : index
    %115 = vector.load %arg2[%c3_74, %c1_75, %c0_76, %c0_77] : memref<4x4x128x128xbf16, #tpu.memory_space<vmem>>, vector<1x1x128x128xbf16>
    %116 = vector.shape_cast %115 : vector<1x1x128x128xbf16> to vector<128x128xbf16>
    %cst_78 = arith.constant dense<0.000000e+00> : vector<9x128xf32>
    %117 = tpu.matmul %114, %116, %cst_78 {dimension_numbers = #tpu.dot_dimension_numbers<[1], [0], [0], [1], [0, 0, 1, 1], [], []>} : vector<9x128xbf16>, vector<128x128xbf16>, vector<9x128xf32> -> vector<9x128xf32>
    %118 = arith.addf %112, %117 : vector<9x128xf32>
    %119 = vector.extract_strided_slice %33 {offsets = [3, 2, 0], sizes = [3, 3, 128], strides = [1, 1, 1]} : vector<6x6x128xbf16> to vector<3x3x128xbf16>
    %120 = vector.shape_cast %119 : vector<3x3x128xbf16> to vector<9x128xbf16>
    %c3_79 = arith.constant 3 : index
    %c2_80 = arith.constant 2 : index
    %c0_81 = arith.constant 0 : index
    %c0_82 = arith.constant 0 : index
    %121 = vector.load %arg2[%c3_79, %c2_80, %c0_81, %c0_82] : memref<4x4x128x128xbf16, #tpu.memory_space<vmem>>, vector<1x1x128x128xbf16>
    %122 = vector.shape_cast %121 : vector<1x1x128x128xbf16> to vector<128x128xbf16>
    %cst_83 = arith.constant dense<0.000000e+00> : vector<9x128xf32>
    %123 = tpu.matmul %120, %122, %cst_83 {dimension_numbers = #tpu.dot_dimension_numbers<[1], [0], [0], [1], [0, 0, 1, 1], [], []>} : vector<9x128xbf16>, vector<128x128xbf16>, vector<9x128xf32> -> vector<9x128xf32>
    %124 = arith.addf %118, %123 : vector<9x128xf32>
    %125 = vector.extract_strided_slice %33 {offsets = [3, 3, 0], sizes = [3, 3, 128], strides = [1, 1, 1]} : vector<6x6x128xbf16> to vector<3x3x128xbf16>
    %126 = vector.shape_cast %125 : vector<3x3x128xbf16> to vector<9x128xbf16>
    %c3_84 = arith.constant 3 : index
    %c3_85 = arith.constant 3 : index
    %c0_86 = arith.constant 0 : index
    %c0_87 = arith.constant 0 : index
    %127 = vector.load %arg2[%c3_84, %c3_85, %c0_86, %c0_87] : memref<4x4x128x128xbf16, #tpu.memory_space<vmem>>, vector<1x1x128x128xbf16>
    %128 = vector.shape_cast %127 : vector<1x1x128x128xbf16> to vector<128x128xbf16>
    %cst_88 = arith.constant dense<0.000000e+00> : vector<9x128xf32>
    %129 = tpu.matmul %126, %128, %cst_88 {dimension_numbers = #tpu.dot_dimension_numbers<[1], [0], [0], [1], [0, 0, 1, 1], [], []>} : vector<9x128xbf16>, vector<128x128xbf16>, vector<9x128xf32> -> vector<9x128xf32>
    %130 = arith.addf %124, %129 : vector<9x128xf32>
    %c0_89 = arith.constant 0 : index
    %c0_90 = arith.constant 0 : index
    %131 = vector.load %arg3[%c0_89, %c0_90] : memref<1x128xf32, #tpu.memory_space<vmem>>, vector<1x128xf32>
    %132 = vector.broadcast %131 : vector<1x128xf32> to vector<9x128xf32>
    %133 = arith.addf %130, %132 : vector<9x128xf32>
    %134 = vector.shape_cast %133 : vector<9x128xf32> to vector<1x3x3x128xf32>
    %c0_91 = arith.constant 0 : index
    %c0_92 = arith.constant 0 : index
    %c0_93 = arith.constant 0 : index
    %c0_94 = arith.constant 0 : index
    %135 = vector.load %arg6[%c0_91, %c0_92, %c0_93, %c0_94] : memref<1x3x3x128xf32, #tpu.memory_space<vmem>>, vector<1x3x3x128xf32>
    tpu.vector_store %arg6[%c0_91, %c0_92, %c0_93, %c0_94], %134 {strides = array<i32>} : memref<1x3x3x128xf32, #tpu.memory_space<vmem>>, vector<1x3x3x128xf32>,
    return
  }
  func.func @transform_0(%arg0: i32) -> (i32, i32, i32, i32) {
    %c0_i32 = arith.constant 0 : i32
    %c0_i32_0 = arith.constant 0 : i32
    %c0_i32_1 = arith.constant 0 : i32
    %c0_i32_2 = arith.constant 0 : i32
    return %arg0, %c0_i32, %c0_i32_0, %c0_i32_1 : i32, i32, i32, i32
  }
  func.func @transform_1(%arg0: i32) -> (i32, i32, i32, i32) {
    %c0_i32 = arith.constant 0 : i32
    %c0_i32_0 = arith.constant 0 : i32
    %c0_i32_1 = arith.constant 0 : i32
    %c0_i32_2 = arith.constant 0 : i32
    %c0_i32_3 = arith.constant 0 : i32
    return %c0_i32, %c0_i32_0, %c0_i32_1, %c0_i32_2 : i32, i32, i32, i32
  }
  func.func @transform_2(%arg0: i32) -> (i32, i32) {
    %c0_i32 = arith.constant 0 : i32
    %c0_i32_0 = arith.constant 0 : i32
    %c0_i32_1 = arith.constant 0 : i32
    return %c0_i32, %c0_i32_0 : i32, i32
  }
  func.func @transform_3(%arg0: i32) -> (i32, i32) {
    %c0_i32 = arith.constant 0 : i32
    %c0_i32_0 = arith.constant 0 : i32
    %c0_i32_1 = arith.constant 0 : i32
    return %c0_i32, %c0_i32_0 : i32, i32
  }
  func.func @transform_4(%arg0: i32) -> (i32, i32) {
    %c0_i32 = arith.constant 0 : i32
    %c0_i32_0 = arith.constant 0 : i32
    %c0_i32_1 = arith.constant 0 : i32
    return %c0_i32, %c0_i32_0 : i32, i32
  }
  func.func @transform_5(%arg0: i32) -> (i32, i32, i32, i32) {
    %c0_i32 = arith.constant 0 : i32
    %c0_i32_0 = arith.constant 0 : i32
    %c0_i32_1 = arith.constant 0 : i32
    %c0_i32_2 = arith.constant 0 : i32
    return %arg0, %c0_i32, %c0_i32_0, %c0_i32_1 : i32, i32, i32, i32
  }
}

</mosaic_0001>

<bundles_post_ra>
// kernel: patch_discriminator_forward.3
= control target key start
LH: loop header
LB: loop body
LE: loop exit
PB: predicated region body
PF: predicated region fallthrough
CT: control target
= control target key end

     0   :  { %s1076_s12 = smov 0   ;;  %s1269_s0 = inlined_call_operand.vmem [shape: bf16[2,9,9,24], index: 0, kind: input, shape index: {}]   ;;  %s1270_s1 = inlined_call_operand.vmem [shape: bf16[2,2,24,64], index: 1, kind: input, shape index: {}]   ;;  %s1271_s2 = inlined_call_operand.vmem [shape: f32[1,64], index: 2, kind: input, shape index: {}]   ;;  %s1272_s3 = inlined_call_operand.vmem [shape: bf16[2,8,8,64], index: 3, kind: output, shape index: {}]  }
   0x1 LB: > { %s862_s13 = sadd.s32 4294967295, %s1054_s12   ;;  %p866_p0 = scmp.ge.s32.totalorder %s1054_s12, 1  ;;  %s1054_s12 = sphi %s1076_s12, %s13_s12  }
   0x2   : > { %p137_p1 = scmp.lt.s32.totalorder %s1054_s12, 3 }
   0x4   : > { %p138_p2 = pnand %p866_p0, %p137_p1 }
   0x5   : > { %v1032_v0 = vld [vmem:[%s1270_s1 + $0x18] sm:$0xff] (!%p138_p2)   ;;  %vm346_vm0 = vcmask (!%p138_p2), 1043456   ;;  %v1033_v1 = vld [vmem:[%s1270_s1 + $0x20] ss:$0 sps:$4 sm:$0xff] (!%p138_p2)   ;;  %p161_p3 = scmp.lt.s32.totalorder (!%p138_p2), %s862_s13, 1  ;;  %v1036_v2 = vld [vmem:[%s1270_s1 + $0xc] sm:$0xff] (!%p138_p2)  }
   0x6   : > { %141 = sbr.rel (%p138_p2) target bundleno = 286 (0x11e), region = 32  ;;  %971 = vmatprep.subr.bf16.mxu0 (!%p138_p2), %v1032_v0  ;;  %v1038_v3 = vld [vmem:[%s1270_s1 + $0x14] ss:$0 sps:$4 sm:$0xff] (!%p138_p2)   ;;  %v556_v4 = vsel (!%p138_p2), %vm346_vm0, %v1033_v1, 0  ;;  %vm333_vm1 = vcmask (!%p138_p2), 195584   ;;  %947 = vmatprep.subr.bf16.mxu1 (!%p138_p2), %v1036_v2  ;;  %v1104_v5 = vld [vmem:[%s1270_s1] sm:$0xff] (!%p138_p2)  }
   0x7   : > { %972 = vmatpush3.bf16.msra.mxu0 (!%p138_p2), %v1032_v0  ;;  %948 = vmatpush3.bf16.msra.mxu1 (!%p138_p2), %v1036_v2  ;;  %vm193_vm2 = vsmask.f32 (!%p138_p2), 3328  ;;  %v348_v6 = vsel (!%p138_p2), %vm346_vm0, %v1038_v3, 0  ;;  %v1042_v7 = vld [vmem:[%s1270_s1 + $0x24] sm:$0xff] (!%p138_p2)   ;;  %vm194_vm3 = vsmask.f32 (!%p138_p2), 7440 }
   0x8   : > { %1021 = vmatprep.subr.msk.bf16.mxu0 (!%p138_p2), %vm346_vm0, %v1033_v1  ;;  %1019 = vmatprep.subr.msk.bf16.mxu1 (!%p138_p2), %vm346_vm0, %v1038_v3  ;;  %v1133_v14 = vld [vmem:[%s1270_s1 + $0x2c] ss:$0 sps:$4 sm:$0xff] (!%p138_p2)   ;;  %vm1173_vm4 = vmor (!%p138_p2), %vm193_vm2, %vm194_vm3  ;;  %vm798_vm7 = vcmask (!%p138_p2), 519168  }
   0xb   : > { %974 = vmatpush3.bf16.msra.mxu0 (!%p138_p2), %v556_v4  ;;  %950 = vmatpush3.bf16.msra.mxu1 (!%p138_p2), %v348_v6 }
   0xc   : > { %983 = vmatprep.subr.bf16.mxu0 (!%p138_p2), %v1042_v7  ;;  %959 = vmatprep.subr.bf16.mxu1 (!%p138_p2), %v1104_v5 }
   0xd   : > { %s1276_s13 = smov (!%p161_p3, %s862_s13), 1 }
   0xe   : > { %s1023_s22 = smul.u32 72, %s1276_s13  ;;  %s922_s9 = sshll.u32 %s1276_s13, 5 }
   0xf   : > { %s1248_s14 = scalar_lea.vmem %s1272_s3, %s922_s9 }
  0x10   : > { %s1114_s29 = scalar_lea.vmem %s1269_s0, %s1023_s22 }
  0x11   : > { %v1117_v8 = vld [vmem:[%s1114_s29 + $0x8] sm:$0xf]  ;;  %v1120_v9 = vld [vmem:[%s1114_s29 + $0x10] sm:$0xf]  ;;  %v1123_v10 = vld [vmem:[%s1114_s29 + $0x18] sm:$0xf] }
  0x12   : > { %v225_v11 = vshrl.u32 %v1120_v9, 16  ;;  %v228_v12 = vshll.u32 %v1120_v9, 16  ;;  %v1128_v13 = vld [vmem:[%s1114_s29 + $0x20] sm:$0xf]  ;;  %v211_v15 = vshrl.u32 %v1117_v8, 16  ;;  %v214_v16 = vshll.u32 %v1117_v8, 16 }
  0x13   : > { %v896_v17 = vcombine.low %v1117_v8, %v1120_v9  ;;  %v1140_v18 = vld [vmem:[%s1114_s29 + $0x28] sm:$0xf]  ;;  %v1143_v19 = vld [vmem:[%s1114_s29 + $0x30] sm:$0xf]  ;;  %v253_v22 = vshrl.u32 %v1128_v13, 16  ;;  %v897_v23 = vcombine.low %v1123_v10, %v1128_v13  ;;  %v256_v25 = vshll.u32 %v1128_v13, 16 }
  0x14   : > { %v227_v20 = vrot.slane %v225_v11, 4  ;;  %v230_v21 = vrot.slane %v228_v12, 5  ;;  %v1150_v24 = vld [vmem:[%s1114_s29] sm:$0xf]  ;;  %v267_v26 = vshrl.u32 %v1140_v18, 16  ;;  %v270_v27 = vshll.u32 %v1140_v18, 16 }
  0x15   : > { %975 = vmatprep.mubr.msk.bf16.mxu0 %vm333_vm1, %v896_v17  ;;  %v898_v28 = vcombine.low %v1140_v18, %v1143_v19  ;;  %v173_v29 = vld [vmem:[%s1114_s29 + $0x4] sm:$0x1]  ;;  %v281_v30 = vshrl.u32 %v1143_v19, 16  ;;  %v284_v31 = vshll.u32 %v1143_v19, 16  ;;  %v175_v32 = vld [vmem:[%s1114_s29 + $0xc] sm:$0x1] }
  0x16   : > { %976 = vmatmul.mubr.msk.bf16.vlgmr.msra.gmra.mrb[0].mxu0 %vm333_vm1, %v897_v23  ;;  %v177_v33 = vld [vmem:[%s1114_s29 + $0x14] sm:$0x1]  ;;  %v231_v34 = vor.u32 %v230_v21, %v227_v20  ;;  %v197_v35 = vshrl.u32 %v1150_v24, 16  ;;  %v200_v36 = vshll.u32 %v1150_v24, 16  ;;  %v206_v37 = vshll.u32 %v173_v29, 16 }
  0x17   : > { %979 = vmatprep.mubr.msk.bf16.mxu0 %vm333_vm1, %v898_v28  ;;  %v213_v38 = vrot.slane %v211_v15, 4  ;;  %984 = vmatpush3.bf16.msra.mxu0 %v1042_v7  ;;  %v179_v39 = vld [vmem:[%s1114_s29 + $0x1c] sm:$0x1]  ;;  %v216_v40 = vrot.slane %v214_v16, 5  ;;  %v220_v41 = vshll.u32 %v175_v32, 16  ;;  %v234_v43 = vshll.u32 %v177_v33, 16 }
  0x18   : > { %v232_v42 = vrot.slane %v231_v34, 4  ;;  %1022 = vmatprep.subr.msk.bf16.mxu0 %vm346_vm0, %v1133_v14  ;;  %v181_v44 = vld [vmem:[%s1114_s29 + $0x24] sm:$0x1]  ;;  %v199_v46 = vrot.slane %v197_v35, 4  ;;  %v202_v47 = vrot.slane %v200_v36, 5  ;;  %v208_v48 = vrot.slane %v206_v37, 5 }
  0x19   : > { %v239_v49 = vshrl.u32 %v1123_v10, 16  ;;  %v217_v50 = vor.u32 %v216_v40, %v213_v38  ;;  %v222_v51 = vrot.slane %v220_v41, 5  ;;  %v236_v52 = vrot.slane %v234_v43, 5  ;;  %v1180_v54 = vld [vmem:[%s1114_s29 + $0x38] sm:$0xf] }
  0x1a   : > { %v242_v53 = vshll.u32 %v1123_v10, 16  ;;  %v203_v55 = vor.u32 %v202_v47, %v199_v46  ;;  %v248_v57 = vshll.u32 %v179_v39, 16  ;;  %v255_v58 = vrot.slane %v253_v22, 4  ;;  %v188_v63 = vld [vmem:[%s1114_s29 + $0x40] sm:$0xf] }
  0x1b   : > { %v241_v56 = vrot.slane %v239_v49, 4  ;;  %v218_v59 = vrot.slane %v217_v50, 4  ;;  %v237_v60 = vsel %vm1173_vm4, %v232_v42, %v236_v52  ;;  %v258_v62 = vrot.slane %v256_v25, 5  ;;  %v183_v20 = vld [vmem:[%s1114_s29 + $0x2c] sm:$0x1] }
  0x1c   : > { %v244_v61 = vrot.slane %v242_v53, 5  ;;  %v204_v0 = vrot.slane %v203_v55, 4  ;;  %v250_v1 = vrot.slane %v248_v57, 5  ;;  %v262_v2 = vshll.u32 %v181_v44, 16  ;;  %v185_v34 = vld [vmem:[%s1114_s29 + $0x34] sm:$0x1] }
  0x1d   : > { %v295_v3 = vshrl.u32 %v1180_v54, 16  ;;  %v223_v4 = vsel %vm1173_vm4, %v218_v59, %v222_v51  ;;  %v259_v7 = vor.u32 %v258_v62, %v255_v58  ;;  %v298_v11 = vshll.u32 %v1180_v54, 16  ;;  %v1044_v39 = vld [vmem:[%s1270_s1 + $0x8] ss:$0 sps:$4 sm:$0xff]   ;;  %v189_v47 = vld [vmem:[%s1114_s29 + $0x44] sm:$0x1] }
  0x1e   : > { %v245_v6 = vor.u32 %v244_v61, %v241_v56  ;;  %v209_v12 = vsel %vm1173_vm4, %v204_v0, %v208_v48  ;;  %v264_v15 = vrot.slane %v262_v2, 5  ;;  %v909_v16 = vcombine.low %v223_v4, %v237_v60 }
  0x1f   : > { %v899_v17 = vcombine.low %v1180_v54, %v188_v63  ;;  %v260_v22 = vrot.slane %v259_v7, 4  ;;  %v873_v23 = vcombine.low %v209_v12, %v223_v4  ;;  %v632_v25 = vshrl.u32 %v188_v63, 16 }
  0x20   : > { %v246_v21 = vrot.slane %v245_v6, 4  ;;  %v635_v28 = vshll.u32 %v188_v63, 16  ;;  %v676_v29 = vsel %vm346_vm0, %v1133_v14, 0  ;;  %v269_v32 = vrot.slane %v267_v26, 4  ;;  %v187_v14 = vld [vmem:[%s1114_s29 + $0x3c] sm:$0x1] }
  0x21   : > { %980 = vmatmul.mubr.msk.bf16.gmra.mrb[4].mxu0 %vm333_vm1, %v899_v17  ;;  %v272_v33 = vrot.slane %v270_v27, 5  ;;  %v265_v36 = vsel %vm1173_vm4, %v260_v22, %v264_v15  ;;  %951 = vmatprep.mubr.msk.bf16.mxu1 %vm333_vm1, %v873_v23  ;;  %v634_v37 = vrot.slane %v632_v25, 4  ;;  %v276_v38 = vshll.u32 %v183_v20, 16 }
  0x22   : > { %v251_v35 = vsel %vm1173_vm4, %v246_v21, %v250_v1  ;;  %986 = vmatpush3.bf16.msra.mxu0 %v676_v29  ;;  %v637_v40 = vrot.slane %v635_v28, 5  ;;  %987 = vmatprep.mubr.msk.bf16.mxu0 %vm333_vm1, %v909_v16  ;;  %v283_v43 = vrot.slane %v281_v30, 4  ;;  %v286_v44 = vrot.slane %v284_v31, 5 }
  0x23   : > { %v874_v26 = vcombine.low %v237_v60, %v251_v35  ;;  %v910_v27 = vcombine.low %v251_v35, %v265_v36  ;;  %v273_v41 = vor.u32 %v272_v33, %v269_v32  ;;  %v278_v42 = vrot.slane %v276_v38, 5 }
  0x24   : > { %v290_v46 = vshll.u32 %v185_v34, 16  ;;  %v297_v49 = vrot.slane %v295_v3, 4  ;;  %v300_v50 = vrot.slane %v298_v11, 5  ;;  %v304_v51 = vshll.u32 %v187_v14, 16 }
  0x25   : > { %952 = vmatmul.mubr.msk.bf16.vlgmr.msra.gmra.mrb[0].mxu1 %vm333_vm1, %v874_v26  ;;  %v274_v48 = vrot.slane %v273_v41, 4  ;;  %v287_v52 = vor.u32 %v286_v44, %v283_v43  ;;  %v457_v55 = vsel %vm346_vm0, %v1044_v39, 0  ;;  %v638_v56 = vor.u32 %v637_v40, %v634_v37 }
  0x26   : > { %960 = vmatpush3.bf16.msra.mxu1 %v1104_v5  ;;  %v292_v53 = vrot.slane %v290_v46, 5  ;;  %v301_v31 = vor.u32 %v300_v50, %v297_v49  ;;  %v306_v57 = vrot.slane %v304_v51, 5  ;;  %v641_v58 = vshll.u32 %v189_v47, 16 }
  0x27   : > { %v279_v30 = vsel %vm1173_vm4, %v274_v48, %v278_v42  ;;  %1020 = vmatprep.subr.msk.bf16.mxu1 %vm346_vm0, %v1044_v39  ;;  %v288_v60 = vrot.slane %v287_v52, 4  ;;  %v639_v61 = vrot.slane %v638_v56, 4  ;;  %v883_v2 = vcombine.low %v1150_v24, %v1117_v8 }
  0x28   : > { %v875_v59 = vcombine.low %v265_v36, %v279_v30  ;;  %v302_v62 = vrot.slane %v301_v31, 4  ;;  %v643_v5 = vrot.slane %v641_v58, 5  ;;  %v884_v7 = vcombine.low %v1120_v9, %v1123_v10 }
  0x29   : > { %988 = vmatmul.mubr.msk.bf16.vlgmr.msra.gmra.mrb[0].mxu0 %vm333_vm1, %v910_v27  ;;  %v293_v63 = vsel %vm1173_vm4, %v288_v60, %v292_v53  ;;  %v885_v11 = vcombine.low %v1128_v13, %v1140_v18  ;;  %v886_v8 = vcombine.low %v1143_v19, %v1180_v54  ;;  %v919_v13 = vld [vmem:[%s1271_s2] ss:$0 sm:$0xff] }
  0x2a   : > { %955 = vmatprep.mubr.msk.bf16.mxu1 %vm333_vm1, %v875_v59  ;;  %962 = vmatpush3.bf16.msra.mxu1 %v457_v55  ;;  %v307_v0 = vsel %vm1173_vm4, %v302_v62, %v306_v57  ;;  %v911_v1 = vcombine.low %v279_v30, %v293_v63  ;;  %v644_v3 = vsel %vm1173_vm4, %v639_v61, %v643_v5 }
  0x2b   : > { %v876_v4 = vcombine.low %v293_v63, %v307_v0  ;;  %v912_v6 = vcombine.low %v307_v0, %v644_v3 }
  0x2c   : > { %991 = vmatprep.mubr.msk.bf16.mxu0 %vm333_vm1, %v911_v1 }
  0x2d   : > { %956 = vmatmul.mubr.msk.bf16.gmra.mrb[4].mxu1 %vm333_vm1, %v876_v4 }
  0x2e   : > { %963 = vmatprep.mubr.msk.bf16.mxu1 %vm333_vm1, %v883_v2 }
  0x31   : > { %992 = vmatmul.mubr.msk.bf16.gmra.mrb[4].mxu0 %vm333_vm1, %v912_v6 }
  0x35   : > { %964 = vmatmul.mubr.msk.bf16.vlgmr.msra.gmra.mrb[0].mxu1 %vm333_vm1, %v884_v7 }
  0x36   : > { %967 = vmatprep.mubr.msk.bf16.mxu1 %vm333_vm1, %v885_v11 }
  0x3d   : > { %968 = vmatmul.mubr.msk.bf16.gmra.mrb[4].mxu1 %vm333_vm1, %v886_v8 }
  0xfc   : > { %v989_v24 = vpop.f32.mrb[0].mxu0 }
  0xfd   : > { %v712_v45 = vpop.f32.mrb[1].mxu0 }
  0xfe   : > { %v990_v12 = vpop.f32.mrb[2].mxu0 }
  0xff   : > { %v715_v15 = vpop.f32.mrb[3].mxu0 }
 0x104   : > { %v993_v16 = vpop.f32.mrb[4].mxu0 }
 0x105   : > { %v728_v17 = vpop.f32.mrb[5].mxu0 }
 0x106   : > { %v994_v9 = vpop.f32.mrb[6].mxu0 }
 0x107   : > { %v731_v10 = vpop.f32.mrb[7].mxu0 }
 0x108   : > { %v965_v20 = vpop.f32.mrb[0].mxu1 }
 0x109   : > { %v995_v18 = vadd.f32 %v989_v24, %v965_v20  ;;  %v493_v21 = vpop.f32.mrb[1].mxu1 }
 0x10a   : > { %v996_v22 = vadd.f32 %v712_v45, %v493_v21  ;;  %v966_v19 = vpop.f32.mrb[2].mxu1 }
 0x10b   : > { %v760_v54 = vadd.f32 %v995_v18, %v919_v13  ;;  %v997_v23 = vadd.f32 %v990_v12, %v966_v19  ;;  %v496_v25 = vpop.f32.mrb[3].mxu1 }
 0x10c   : > { %v758_v28 = vadd.f32 %v996_v22, %v919_v13  ;;  %v998_v29 = vadd.f32 %v715_v15, %v496_v25 }
 0x10d   : > { %vm768_vm5 = vcmp.ge.f32.partialorder %v760_v54, 0.0  ;;  %v776_v32 = vmul.f32 0.2, %v760_v54  ;;  %v761_v33 = vadd.f32 %v997_v23, %v919_v13 }
 0x10e   : > { %vm766_vm6 = vcmp.ge.f32.partialorder %v758_v28, 0.0  ;;  %v774_v34 = vmul.f32 0.2, %v758_v28  ;;  %v759_v35 = vadd.f32 %v998_v29, %v919_v13 }
 0x10f   : > { %v784_v36 = vsel %vm768_vm5, %v760_v54, %v776_v32  ;;  %vm769_vm8 = vcmp.ge.f32.partialorder %v761_v33, 0.0  ;;  %v777_v37 = vmul.f32 0.2, %v761_v33 }
 0x110   : > { %v792_v38 = vpack.c.bf16 %v784_v36, %v784_v36  ;;  %v782_v39 = vsel %vm766_vm6, %v758_v28, %v774_v34  ;;  %vm767_vm9 = vcmp.ge.f32.partialorder %v759_v35, 0.0  ;;  %v775_v14 = vmul.f32 0.2, %v759_v35  ;;  %v969_v26 = vpop.f32.mrb[4].mxu1 }
 0x111   : > { %v790_v27 = vpack.c.bf16 %v782_v39, %v782_v39  ;;  %v785_v40 = vsel %vm769_vm8, %v761_v33, %v777_v37  ;;  %v999_v41 = vadd.f32 %v993_v16, %v969_v26  ;;  %v509_v42 = vpop.f32.mrb[5].mxu1 }
 0x112   : > { %801 = vst.msk [vmem:[%s1248_s14 + $0x8] sm:$0xf] %vm798_vm7, %v792_v38  ;;  %v793_v43 = vpack.c.bf16 %v785_v40, %v785_v40  ;;  %v783_v44 = vsel %vm767_vm9, %v759_v35, %v775_v14  ;;  %v1000_v46 = vadd.f32 %v728_v17, %v509_v42  ;;  %v970_v47 = vpop.f32.mrb[6].mxu1 }
 0x113   : > { %799 = vst.msk [vmem:[%s1248_s14] sm:$0xf] %vm798_vm7, %v790_v27  ;;  %v791_v48 = vpack.c.bf16 %v783_v44, %v783_v44  ;;  %v764_v49 = vadd.f32 %v999_v41, %v919_v13  ;;  %v1001_v50 = vadd.f32 %v994_v9, %v970_v47  ;;  %v512_v51 = vpop.f32.mrb[7].mxu1 }
 0x114   : > { %802 = vst.msk [vmem:[%s1248_s14 + $0xc] sm:$0xf] %vm798_vm7, %v793_v43  ;;  %v762_v52 = vadd.f32 %v1000_v46, %v919_v13  ;;  %v1002_v53 = vadd.f32 %v731_v10, %v512_v51 }
 0x115   : > { %800 = vst.msk [vmem:[%s1248_s14 + $0x4] sm:$0xf] %vm798_vm7, %v791_v48  ;;  %vm772_vm10 = vcmp.ge.f32.partialorder %v764_v49, 0.0  ;;  %v780_v55 = vmul.f32 0.2, %v764_v49  ;;  %v765_v56 = vadd.f32 %v1001_v50, %v919_v13 }
 0x116   : > { %vm770_vm11 = vcmp.ge.f32.partialorder %v762_v52, 0.0  ;;  %v778_v30 = vmul.f32 0.2, %v762_v52  ;;  %v763_v31 = vadd.f32 %v1002_v53, %v919_v13 }
 0x117   : > { %v788_v57 = vsel %vm772_vm10, %v764_v49, %v780_v55  ;;  %vm773_vm12 = vcmp.ge.f32.partialorder %v765_v56, 0.0  ;;  %v781_v58 = vmul.f32 0.2, %v765_v56 }
 0x118   : > { %v796_v59 = vpack.c.bf16 %v788_v57, %v788_v57  ;;  %v786_v60 = vsel %vm770_vm11, %v762_v52, %v778_v30  ;;  %vm771_vm13 = vcmp.ge.f32.partialorder %v763_v31, 0.0  ;;  %v779_v61 = vmul.f32 0.2, %v763_v31 }
 0x119   : > { %v794_v62 = vpack.c.bf16 %v786_v60, %v786_v60  ;;  %v789_v5 = vsel %vm773_vm12, %v765_v56, %v781_v58 }
 0x11a   : > { %805 = vst.msk [vmem:[%s1248_s14 + $0x18] sm:$0xf] %vm798_vm7, %v796_v59  ;;  %v797_v63 = vpack.c.bf16 %v789_v5, %v789_v5  ;;  %v787_v0 = vsel %vm771_vm13, %v763_v31, %v779_v61 }
 0x11b   : > { %803 = vst.msk [vmem:[%s1248_s14 + $0x10] sm:$0xf] %vm798_vm7, %v794_v62  ;;  %v795_v1 = vpack.c.bf16 %v787_v0, %v787_v0 }
 0x11c   : > { %806 = vst.msk [vmem:[%s1248_s14 + $0x1c] sm:$0xf] %vm798_vm7, %v797_v63 }
 0x11d   : > { %804 = vst.msk [vmem:[%s1248_s14 + $0x14] sm:$0xf] %vm798_vm7, %v795_v1 }
 0x11e PF: > { %s13_s12 = sadd.s32 1, %s1054_s12  }
 0x11f   : > { %p10_p4 = scmp.ge.s32.totalorder %s13_s12, 4  }
 0x121   :  { %12 = sbr.rel (!%p10_p4) target bundleno = 1 (0x1), region = 65 }

// kernel: patch_discriminator_forward.4
= control target key start
LH: loop header
LB: loop body
LE: loop exit
PB: predicated region body
PF: predicated region fallthrough
CT: control target
= control target key end

     0   :  { %s1657_s18 = smov 0   ;;  %s1965_s0 = inlined_call_operand.vmem [shape: bf16[2,5,5,256], index: 0, kind: input, shape index: {}]   ;;  %s1966_s1 = inlined_call_operand.vmem [shape: bf16[2,2,256,128], index: 1, kind: input, shape index: {}]   ;;  %s1967_s2 = inlined_call_operand.vmem [shape: f32[1,128], index: 2, kind: input, shape index: {}]   ;;  %s1968_s3 = inlined_call_operand.vmem [shape: bf16[2,4,4,128], index: 3, kind: output, shape index: {0}]   ;;  %s1969_s4 = inlined_call_operand.vmem [shape: f32[2,1,128], index: 4, kind: output, shape index: {1}]   ;;  %s1970_s5 = inlined_call_operand.vmem [shape: f32[2,1,128], index: 5, kind: output, shape index: {2}]  }
   0x1 LB: > { %s1279_s19 = sadd.s32 4294967295, %s1624_s18   ;;  %p1283_p0 = scmp.ge.s32.totalorder %s1624_s18, 1  ;;  %s1624_s18 = sphi %s1657_s18, %s16_s18  }
   0x2   : > { %p192_p1 = scmp.lt.s32.totalorder %s1624_s18, 3 }
   0x4   : > { %p193_p2 = pnand %p1283_p0, %p192_p1 }
   0x5   : > { %v1554_v0 = vld [vmem:[%s1966_s1 + $0xc0] sm:$0xff] (!%p193_p2)   ;;  %v1558_v4 = vld [vmem:[%s1966_s1 + $0xc8] sm:$0xff] (!%p193_p2)   ;;  %v1562_v8 = vld [vmem:[%s1966_s1 + $0xd0] sm:$0xff] (!%p193_p2)   ;;  %p226_p3 = scmp.lt.s32.totalorder (!%p193_p2), %s1279_s19, 1  ;;  %v417_v28 = vlaneseq (!%p193_p2)  ;;  %vm316_vm0 = vsmask.f32 (!%p193_p2), 1280 }
   0x6   : > { %196 = sbr.rel (%p193_p2) target bundleno = 316 (0x13c), region = 32  ;;  %v1555_v1 = vld [vmem:[%s1966_s1 + $0x40] sm:$0xff] (!%p193_p2)   ;;  %1456 = vmatprep.subr.bf16.mxu0 (!%p193_p2), %v1554_v0  ;;  %v1559_v5 = vld [vmem:[%s1966_s1 + $0x48] sm:$0xff] (!%p193_p2)   ;;  %v1563_v9 = vld [vmem:[%s1966_s1 + $0x50] sm:$0xff] (!%p193_p2)   ;;  %vm317_vm1 = vsmask.f32 (!%p193_p2), 3336 }
   0x7   : > { %v1556_v2 = vld [vmem:[%s1966_s1 + $0x80] sm:$0xff] (!%p193_p2)   ;;  %1478 = vmatprep.subr.bf16.mxu1 (!%p193_p2), %v1555_v1  ;;  %v1560_v6 = vld [vmem:[%s1966_s1 + $0x88] sm:$0xff] (!%p193_p2)   ;;  %v1564_v10 = vld [vmem:[%s1966_s1 + $0x90] sm:$0xff] (!%p193_p2)   ;;  %v1773_v33 = vshrl.u32 (!%p193_p2), %v417_v28, 7  ;;  %vm319_vm2 = vsmask.f32 (!%p193_p2), 5392 }
   0x8   : > { %v1557_v3 = vld [vmem:[%s1966_s1] sm:$0xff] (!%p193_p2)   ;;  %1457 = vmatpush3.bf16.msra.mxu0 (!%p193_p2), %v1556_v2  ;;  %v1561_v7 = vld [vmem:[%s1966_s1 + $0x8] sm:$0xff] (!%p193_p2)   ;;  %v1565_v11 = vld [vmem:[%s1966_s1 + $0x10] sm:$0xff] (!%p193_p2)   ;;  %vm321_vm4 = vsmask.f32 (!%p193_p2), 7448 }
   0x9   : > { %1479 = vmatpush3.bf16.msra.mxu1 (!%p193_p2), %v1557_v3  ;;  %1458 = vmatprep.subr.bf16.mxu0 (!%p193_p2), %v1558_v4  ;;  %v1566_v12 = vld [vmem:[%s1966_s1 + $0xd8] sm:$0xff] (!%p193_p2)   ;;  %v1570_v16 = vld [vmem:[%s1966_s1 + $0xe0] sm:$0xff] (!%p193_p2)   ;;  %v1574_v20 = vld [vmem:[%s1966_s1 + $0xe8] sm:$0xff] (!%p193_p2)  }
   0xa   : > { %1480 = vmatprep.subr.bf16.mxu1 (!%p193_p2), %v1559_v5  ;;  %v1567_v13 = vld [vmem:[%s1966_s1 + $0x58] sm:$0xff] (!%p193_p2)   ;;  %v1571_v17 = vld [vmem:[%s1966_s1 + $0x60] sm:$0xff] (!%p193_p2)   ;;  %v1575_v21 = vld [vmem:[%s1966_s1 + $0x68] sm:$0xff] (!%p193_p2)  }
   0xb   : > { %v1568_v14 = vld [vmem:[%s1966_s1 + $0x98] sm:$0xff] (!%p193_p2)   ;;  %v1572_v18 = vld [vmem:[%s1966_s1 + $0xa0] sm:$0xff] (!%p193_p2)   ;;  %v1576_v22 = vld [vmem:[%s1966_s1 + $0xa8] sm:$0xff] (!%p193_p2)  }
   0xc   : > { %1459 = vmatpush3.bf16.msra.mxu0 (!%p193_p2), %v1560_v6  ;;  %v1569_v15 = vld [vmem:[%s1966_s1 + $0x18] sm:$0xff] (!%p193_p2)   ;;  %v1573_v19 = vld [vmem:[%s1966_s1 + $0x20] sm:$0xff] (!%p193_p2)   ;;  %v1577_v23 = vld [vmem:[%s1966_s1 + $0x28] sm:$0xff] (!%p193_p2)  }
   0xd   : > { %1481 = vmatpush3.bf16.msra.mxu1 %v1561_v7  ;;  %1460 = vmatprep.subr.bf16.mxu0 %v1562_v8  ;;  %s1976_s19 = smov (!%p226_p3, %s1279_s19), 1  ;;  %v1578_v24 = vld [vmem:[%s1966_s1 + $0xf0] sm:$0xff]   ;;  %v1582_v29 = vld [vmem:[%s1966_s1 + $0xf8] sm:$0xff]   ;;  %vm318_vm3 = vmor %vm316_vm0, %vm317_vm1 }
   0xe   : > { %1482 = vmatprep.subr.bf16.mxu1 %v1563_v9  ;;  %v1579_v25 = vld [vmem:[%s1966_s1 + $0x70] sm:$0xff]   ;;  %s1544_s26 = smul.u32 40, %s1976_s19  ;;  %v1583_v30 = vld [vmem:[%s1966_s1 + $0x78] sm:$0xff]   ;;  %vm1803_vm5 = vmor %vm318_vm3, %vm319_vm2  ;;  %s1455_s14 = sshll.u32 %s1976_s19, 3 }
   0xf   : > { %v1580_v26 = vld [vmem:[%s1966_s1 + $0xb0] sm:$0xff]   ;;  %v1584_v31 = vld [vmem:[%s1966_s1 + $0xb8] sm:$0xff]   ;;  %v1586_v59 = vld [vmem:[%s1966_s1 + $0x140] sm:$0xff]   ;;  %s235_s17 = scalar_lea.vmem %s1968_s3, %s1455_s14  ;;  %s238_s22 = scalar_lea.vmem %s1969_s4, %s1976_s19 }
  0x10   : > { %1461 = vmatpush3.bf16.msra.mxu0 %v1564_v10  ;;  %v1581_v27 = vld [vmem:[%s1966_s1 + $0x30] sm:$0xff]   ;;  %s1765_s12 = scalar_lea.vmem %s1965_s0, %s1544_s26  ;;  %v1585_v32 = vld [vmem:[%s1966_s1 + $0x38] sm:$0xff]   ;;  %v1587_v60 = vld [vmem:[%s1966_s1 + $0x1c0] sm:$0xff]   ;;  %s241_s25 = scalar_lea.vmem %s1970_s5, %s1976_s19 }
  0x11   : > { %1483 = vmatpush3.bf16.msra.mxu1 %v1565_v11  ;;  %1462 = vmatprep.subr.bf16.mxu0 %v1566_v12  ;;  %v1776_v34 = vld.sshfl [vmem:[%s1765_s12] sm:$0x5f pattern:$0x76325410]  ;;  %vm1819_vm6 = vmor %vm1803_vm5, %vm321_vm4  ;;  %v1598_v2 = vld [vmem:[%s1966_s1 + $0x158] sm:$0xff]  }
  0x12   : > { %1484 = vmatprep.subr.bf16.mxu1 %v1567_v13  ;;  %v1779_v35 = vld.sshfl [vmem:[%s1765_s12 + $0x8] sm:$0x5f pattern:$0x76325410]  ;;  %v312_v36 = vcombine.high %v1776_v34, %v1776_v34  ;;  %v324_v43 = vshrl.u32 %v1776_v34, 16  ;;  %v327_v44 = vshll.u32 %v1776_v34, 16 }
  0x13   : > { %v1784_v37 = vld.sshfl [vmem:[%s1765_s12 + $0x10] sm:$0x5f pattern:$0x76325410]  ;;  %v313_v38 = vcombine.high %v1779_v35, %v1779_v35  ;;  %v569_v41 = vcombine.low %v1776_v34, %v1779_v35  ;;  %v338_v47 = vshrl.u32 %v1779_v35, 16  ;;  %v341_v48 = vshll.u32 %v1779_v35, 16 }
  0x14   : > { %1463 = vmatpush3.bf16.msra.mxu0 %v1568_v14  ;;  %v1789_v39 = vld.sshfl [vmem:[%s1765_s12 + $0x18] sm:$0x5f pattern:$0x76325410]  ;;  %v314_v40 = vcombine.high %v1784_v37, %v1784_v37  ;;  %v767_v45 = vcombine.low %v1779_v35, %v1784_v37  ;;  %v333_v46 = vshll.u32 %v312_v36, 16  ;;  %v326_v51 = vrot.slane %v324_v43, 6 }
  0x15   : > { %1485 = vmatpush3.bf16.msra.mxu1 %v1569_v15  ;;  %1464 = vmatprep.subr.bf16.mxu0 %v1570_v16  ;;  %v315_v42 = vcombine.high %v1789_v39, %v1789_v39  ;;  %v347_v49 = vshll.u32 %v313_v38, 16  ;;  %v329_v52 = vrot.slane %v327_v44, 7  ;;  %v352_v53 = vshrl.u32 %v1784_v37, 16 }
  0x16   : > { %1486 = vmatprep.subr.bf16.mxu1 %v1571_v17  ;;  %v355_v54 = vshll.u32 %v1784_v37, 16  ;;  %v335_v55 = vrot.slane %v333_v46, 7  ;;  %v340_v56 = vrot.slane %v338_v47, 6  ;;  %v343_v57 = vrot.slane %v341_v48, 7 }
  0x17   : > { %v349_v58 = vrot.slane %v347_v49, 7  ;;  %v1355_v61 = vld.sshfl [vmem:[%s1765_s12 + $0x20] sm:$0x5f pattern:$0x76325410]  ;;  %v330_v62 = vor.u32 %v329_v52, %v326_v51  ;;  %v354_v63 = vrot.slane %v352_v53, 6 }
  0x18   : > { %1465 = vmatpush3.bf16.msra.mxu0 %v1572_v18  ;;  %v357_v0 = vrot.slane %v355_v54, 7  ;;  %v361_v1 = vshll.u32 %v314_v40, 16  ;;  %v344_v3 = vor.u32 %v343_v57, %v340_v56  ;;  %v366_v4 = vshrl.u32 %v1789_v39, 16  ;;  %v1589_v52 = vld [vmem:[%s1966_s1 + $0x180] sm:$0xff]   ;;  %v1590_v56 = vld [vmem:[%s1966_s1 + $0x148] sm:$0xff]  }
  0x19   : > { %1487 = vmatpush3.bf16.msra.mxu1 %v1573_v19  ;;  %1466 = vmatprep.subr.bf16.mxu0 %v1574_v20  ;;  %v369_v5 = vshll.u32 %v1789_v39, 16  ;;  %v375_v6 = vshll.u32 %v315_v42, 16  ;;  %v331_v7 = vrot.slane %v330_v62, 2  ;;  %v1626_v16 = vmov 1983009808   ;;  %v1588_v54 = vld [vmem:[%s1966_s1 + $0x100] sm:$0xff]  }
  0x1a   : > { %1488 = vmatprep.subr.bf16.mxu1 %v1575_v21  ;;  %v358_v8 = vor.u32 %v357_v0, %v354_v63  ;;  %v363_v9 = vrot.slane %v361_v1, 7  ;;  %v345_v10 = vrot.slane %v344_v3, 2  ;;  %v368_v11 = vrot.slane %v366_v4, 6  ;;  %v1593_v57 = vld [vmem:[%s1966_s1 + $0x188] sm:$0xff]   ;;  %v1594_v62 = vld [vmem:[%s1966_s1 + $0x150] sm:$0xff]   ;;  %v1599_v0 = vld [vmem:[%s1966_s1 + $0x1d8] sm:$0xff]  }
  0x1b   : > { %v371_v12 = vrot.slane %v369_v5, 7  ;;  %v377_v13 = vrot.slane %v375_v6, 7  ;;  %v336_v14 = vsel %vm1819_vm6, %v331_v7, %v335_v55  ;;  %v415_v17 = vunpack.c.l.s4 %v1626_v16  ;;  %v1597_v63 = vld [vmem:[%s1966_s1 + $0x190] sm:$0xff]   ;;  %v1601_v3 = vld [vmem:[%s1966_s1 + $0x198] sm:$0xff]   ;;  %v1603_v4 = vld [vmem:[%s1966_s1 + $0x1e0] sm:$0xff]  }
  0x1c   : > { %1467 = vmatpush3.bf16.msra.mxu0 %v1576_v22  ;;  %v359_v15 = vrot.slane %v358_v8, 2  ;;  %v926_v18 = vcombine.high %v1355_v61, %v1355_v61  ;;  %v350_v19 = vsel %vm1819_vm6, %v345_v10, %v349_v58  ;;  %v928_v21 = vshrl.u32 %v1355_v61, 16  ;;  %v1596_v1 = vld [vmem:[%s1966_s1 + $0x110] sm:$0xff]   ;;  %v1600_v5 = vld [vmem:[%s1966_s1 + $0x118] sm:$0xff]   ;;  %v1602_v6 = vld [vmem:[%s1966_s1 + $0x160] sm:$0xff]  }
  0x1d   : > { %1489 = vmatpush3.bf16.msra.mxu1 %v1577_v23  ;;  %1468 = vmatprep.subr.bf16.mxu0 %v1578_v24  ;;  %v372_v20 = vor.u32 %v371_v12, %v368_v11  ;;  %v931_v22 = vshll.u32 %v1355_v61, 16  ;;  %v412_v23 = vcombine.low %v336_v14, %v350_v19  ;;  %v416_v24 = vunpack.c.0.s8 %v415_v17  ;;  %v1605_v7 = vld [vmem:[%s1966_s1 + $0x1a0] sm:$0xff]   ;;  %v1607_v8 = vld [vmem:[%s1966_s1 + $0x1e8] sm:$0xff]   ;;  %v1611_v12 = vld [vmem:[%s1966_s1 + $0x1f0] sm:$0xff]  }
  0x1e   : > { %1490 = vmatprep.subr.bf16.mxu1 %v1579_v25  ;;  %v937_v25 = vshll.u32 %v926_v18, 16  ;;  %v768_v36 = vcombine.low %v1789_v39, %v1355_v61  ;;  %v1606_v10 = vld [vmem:[%s1966_s1 + $0x168] sm:$0xff]   ;;  %v1610_v14 = vld [vmem:[%s1966_s1 + $0x170] sm:$0xff]   ;;  %v1615_v16 = vld [vmem:[%s1966_s1 + $0x1f8] sm:$0xff]  }
  0x1f   : > { %v373_v28 = vrot.slane %v372_v20, 2  ;;  %v1609_v11 = vld [vmem:[%s1966_s1 + $0x1a8] sm:$0xff]   ;;  %v1612_v17 = vld [vmem:[%s1966_s1 + $0x130] sm:$0xff]   ;;  %v1614_v18 = vld [vmem:[%s1966_s1 + $0x178] sm:$0xff]  }
  0x20   : > { %1469 = vmatpush3.bf16.msra.mxu0 %v1580_v26  ;;  %v570_v26 = vcombine.low %v1784_v37, %v1789_v39  ;;  %v1616_v20 = vld [vmem:[%s1966_s1 + $0x138] sm:$0xff]  }
  0x21   : > { %1491 = vmatpush3.bf16.msra.mxu1 %v1581_v27  ;;  %1470 = vmatprep.subr.bf16.mxu0 %v1582_v29  ;;  %v364_v27 = vsel %vm1819_vm6, %v359_v15, %v363_v9  ;;  %v930_v29 = vrot.slane %v928_v21, 6  ;;  %v378_v38 = vsel %vm1819_vm6, %v373_v28, %v377_v13  ;;  %v1604_v9 = vld [vmem:[%s1966_s1 + $0x120] sm:$0xff]   ;;  %v1608_v13 = vld [vmem:[%s1966_s1 + $0x128] sm:$0xff]   ;;  %v1613_v15 = vld [vmem:[%s1966_s1 + $0x1b0] sm:$0xff]  }
  0x22   : > { %1492 = vmatprep.subr.bf16.mxu1 %v1583_v30  ;;  %v933_v30 = vrot.slane %v931_v22, 7  ;;  %v974_v42 = vcombine.low %v350_v19, %v364_v27  ;;  %v413_v43 = vcombine.low %v364_v27, %v378_v38  ;;  %v1617_v19 = vld [vmem:[%s1966_s1 + $0x1b8] sm:$0xff]  }
  0x24   : > { %1471 = vmatpush3.bf16.msra.mxu0 %v1584_v31  ;;  %v419_v31 = vsub.s32 %v416_v24, %v1773_v33  ;;  %v934_v40 = vor.u32 %v933_v30, %v930_v29 }
  0x25   : > { %1493 = vmatpush3.bf16.msra.mxu1 %v1585_v32  ;;  %1500 = vmatprep.subr.bf16.mxu0 %v1586_v59  ;;  %v939_v32 = vrot.slane %v937_v25, 7  ;;  %v1595_v59 = vld [vmem:[%s1966_s1 + $0x1d0] sm:$0xff]  }
  0x26   : > { %1522 = vmatprep.subr.bf16.mxu1 %v1587_v60  ;;  %v420_v44 = vrot.slane %v412_v23, %v419_v31  ;;  %v577_v46 = vrot.slane %v569_v41, %v419_v31  ;;  %v584_v47 = vrot.slane %v570_v26, %v419_v31  ;;  %v935_v48 = vrot.slane %v934_v40, 2  ;;  %v1591_v41 = vld [vmem:[%s1966_s1 + $0x1c8] sm:$0xff]  }
  0x27   : > { %v1843_v33 = vrot.slane %v767_v45, %v419_v31  ;;  %v1845_v49 = vrot.slane %v768_v36, %v419_v31  ;;  %v427_v39 = vrot.slane %v413_v43, %v419_v31  ;;  %v1855_v53 = vrot.slane %v974_v42, %v419_v31  ;;  %v1592_v60 = vld [vmem:[%s1966_s1 + $0x108] sm:$0xff]  }
  0x28   : > { %v586_v50 = vcombine.high %v577_v46, %v584_v47  ;;  %v585_v51 = vcombine.low %v577_v46, %v584_v47  ;;  %v940_v34 = vsel %vm1819_vm6, %v935_v48, %v939_v32 }
  0x29   : > { %v429_v35 = vcombine.high %v420_v44, %v427_v39  ;;  %v975_v37 = vcombine.low %v378_v38, %v940_v34  ;;  %v428_v45 = vcombine.low %v420_v44, %v427_v39  ;;  %v784_v55 = vcombine.high %v1843_v33, %v1845_v49 }
  0x2a   : > { %717 = vmatprep.mubr.bf16.mxu1 %v586_v50  ;;  %v783_v22 = vcombine.low %v1843_v33, %v1845_v49 }
  0x2b   : > { %718 = vmatmul.mubr.bf16.vlgmr.msra.gmra.mrb[0].mxu1 %v585_v51  ;;  %560 = vmatprep.mubr.bf16.mxu0 %v429_v35  ;;  %v989_v58 = vrot.slane %v975_v37, %v419_v31 }
  0x2c   : > { %1523 = vmatpush3.bf16.msra.mxu1 %v1589_v52  ;;  %561 = vmatmul.mubr.bf16.vlgmr.msra.gmra.mrb[0].mxu0 %v428_v45 }
  0x2d   : > { %1524 = vmatprep.subr.bf16.mxu1 %v1591_v41  ;;  %1501 = vmatpush3.bf16.msra.mxu0 %v1588_v54  ;;  %v991_v61 = vcombine.high %v1855_v53, %v989_v58  ;;  %v990_v21 = vcombine.low %v1855_v53, %v989_v58  ;;  %v1452_v53 = vld [vmem:[%s1967_s2] ss:$0 sm:$0xff] }
  0x2e   : > { %915 = vmatprep.mubr.bf16.mxu0 %v784_v55  ;;  %1502 = vmatprep.subr.bf16.mxu0 %v1590_v56 }
  0x2f   : > { %1122 = vmatprep.mubr.bf16.mxu1 %v991_v61 }
  0x30   : > { %1525 = vmatpush3.bf16.msra.mxu1 %v1593_v57 }
  0x31   : > { %1526 = vmatprep.subr.bf16.mxu1 %v1595_v59  ;;  %1503 = vmatpush3.bf16.msra.mxu0 %v1592_v60 }
  0x32   : > { %1504 = vmatprep.subr.bf16.mxu0 %v1594_v62 }
  0x34   : > { %1527 = vmatpush3.bf16.msra.mxu1 %v1597_v63 }
  0x35   : > { %1528 = vmatprep.subr.bf16.mxu1 %v1599_v0  ;;  %1505 = vmatpush3.bf16.msra.mxu0 %v1596_v1 }
  0x36   : > { %1506 = vmatprep.subr.bf16.mxu0 %v1598_v2 }
  0x38   : > { %1529 = vmatpush3.bf16.msra.mxu1 %v1601_v3 }
  0x39   : > { %1530 = vmatprep.subr.bf16.mxu1 %v1603_v4  ;;  %1507 = vmatpush3.bf16.msra.mxu0 %v1600_v5 }
  0x3a   : > { %1508 = vmatprep.subr.bf16.mxu0 %v1602_v6 }
  0x3c   : > { %1531 = vmatpush3.bf16.msra.mxu1 %v1605_v7 }
  0x3d   : > { %1532 = vmatprep.subr.bf16.mxu1 %v1607_v8  ;;  %1509 = vmatpush3.bf16.msra.mxu0 %v1604_v9 }
  0x3e   : > { %1510 = vmatprep.subr.bf16.mxu0 %v1606_v10 }
  0x40   : > { %1533 = vmatpush3.bf16.msra.mxu1 %v1609_v11 }
  0x41   : > { %1534 = vmatprep.subr.bf16.mxu1 %v1611_v12  ;;  %1511 = vmatpush3.bf16.msra.mxu0 %v1608_v13 }
  0x42   : > { %1512 = vmatprep.subr.bf16.mxu0 %v1610_v14 }
  0x44   : > { %1535 = vmatpush3.bf16.msra.mxu1 %v1613_v15 }
  0x45   : > { %1536 = vmatprep.subr.bf16.mxu1 %v1615_v16  ;;  %1513 = vmatpush3.bf16.msra.mxu0 %v1612_v17 }
  0x46   : > { %1514 = vmatprep.subr.bf16.mxu0 %v1614_v18 }
  0x48   : > { %1537 = vmatpush3.bf16.msra.mxu1 %v1617_v19 }
  0x49   : > { %1515 = vmatpush3.bf16.msra.mxu0 %v1616_v20 }
  0x4b   : > { %1123 = vmatmul.mubr.bf16.vlgmr.msra.gmra.mrb[4].mxu1 %v990_v21 }
  0x4c   : > { %916 = vmatmul.mubr.bf16.vlgmr.msra.gmra.mrb[4].mxu0 %v783_v22 }
  0xfe   : > { %v1494_v23 = vpop.f32.mrb[0].mxu1 }
  0xff   : > { %v1495_v24 = vpop.f32.mrb[1].mxu1  ;;  %v1472_v25 = vpop.f32.mrb[0].mxu0 }
 0x100   : > { %v1496_v26 = vadd.f32 %v1495_v24, %v1494_v23  ;;  %v1497_v27 = vpop.f32.mrb[2].mxu1  ;;  %v1473_v28 = vpop.f32.mrb[1].mxu0 }
 0x101   : > { %v1498_v29 = vpop.f32.mrb[3].mxu1  ;;  %v1474_v30 = vadd.f32 %v1473_v28, %v1472_v25  ;;  %v1475_v31 = vpop.f32.mrb[2].mxu0 }
 0x102   : > { %v1499_v32 = vadd.f32 %v1498_v29, %v1497_v27  ;;  %v1476_v36 = vpop.f32.mrb[3].mxu0 }
 0x103   : > { %v720_v38 = vadd.f32 %v1496_v26, %v1474_v30  ;;  %v1477_v40 = vadd.f32 %v1476_v36, %v1475_v31 }
 0x105   : > { %v723_v42 = vadd.f32 %v1499_v32, %v1477_v40 }
 0x11e   : > { %v1538_v43 = vpop.f32.mrb[4].mxu1 }
 0x11f   : > { %v1539_v44 = vpop.f32.mrb[5].mxu1  ;;  %v1516_v46 = vpop.f32.mrb[4].mxu0 }
 0x120   : > { %v1540_v47 = vadd.f32 %v1539_v44, %v1538_v43  ;;  %v1541_v48 = vpop.f32.mrb[6].mxu1  ;;  %v1517_v33 = vpop.f32.mrb[5].mxu0 }
 0x121   : > { %v1542_v49 = vpop.f32.mrb[7].mxu1  ;;  %v1518_v39 = vadd.f32 %v1517_v33, %v1516_v46  ;;  %v1519_v50 = vpop.f32.mrb[6].mxu0 }
 0x122   : > { %v1543_v51 = vadd.f32 %v1542_v49, %v1541_v48  ;;  %v1520_v52 = vpop.f32.mrb[7].mxu0 }
 0x123   : > { %v924_v34 = vadd.f32 %v1518_v39, %v720_v38  ;;  %v1521_v41 = vadd.f32 %v1520_v52, %v1519_v50 }
 0x125   : > { %v1131_v35 = vadd.f32 %v1540_v47, %v924_v34  ;;  %v925_v37 = vadd.f32 %v1521_v41, %v723_v42 }
 0x127   : > { %v1140_v45 = vadd.f32 %v1452_v53, %v1131_v35  ;;  %v1132_v54 = vadd.f32 %v1543_v51, %v925_v37 }
 0x129   : > { %v1162_v55 = vcombine.high %v1140_v45, %v1140_v45  ;;  %v1166_v56 = vpack.c.bf16 %v1140_v45, %v1140_v45  ;;  %v1141_v57 = vadd.f32 %v1452_v53, %v1132_v54  ;;  %v1150_v58 = vmul.f32 %v1140_v45, %v1140_v45 }
 0x12b   : > { %v1167_v59 = vpack.c.bf16 %v1162_v55, %v1162_v55  ;;  %1170 = vst [vmem:[%s235_s17] sm:$0x3] %v1166_v56  ;;  %v1142_v60 = vadd.f32 %v1141_v57, %v1140_v45  ;;  %v1151_v61 = vmul.f32 %v1141_v57, %v1141_v57  ;;  %v1163_v62 = vcombine.high %v1141_v57, %v1141_v57 }
 0x12c   : > { %v1168_v63 = vpack.c.bf16 %v1141_v57, %v1141_v57 }
 0x12d   : > { %1171 = vst [vmem:[%s235_s17 + $0x2] sm:$0x3] %v1167_v59  ;;  %v1143_v0 = vrot.slane %v1142_v60, 4  ;;  %v1152_v1 = vadd.f32 %v1151_v61, %v1150_v58  ;;  %v1169_v2 = vpack.c.bf16 %v1163_v62, %v1163_v62 }
 0x12e   : > { %1172 = vst [vmem:[%s235_s17 + $0x4] sm:$0x3] %v1168_v63 }
 0x12f   : > { %v1144_v3 = vadd.f32 %v1143_v0, %v1142_v60  ;;  %v1153_v4 = vrot.slane %v1152_v1, 4  ;;  %1173 = vst [vmem:[%s235_s17 + $0x6] sm:$0x3] %v1169_v2 }
 0x131   : > { %v1145_v5 = vrot.slane %v1144_v3, 2  ;;  %v1154_v6 = vadd.f32 %v1153_v4, %v1152_v1 }
 0x133   : > { %v1146_v7 = vadd.f32 %v1145_v5, %v1144_v3  ;;  %v1155_v8 = vrot.slane %v1154_v6, 2 }
 0x135   : > { %v1147_v9 = vrot.slane %v1146_v7, 1  ;;  %v1156_v10 = vadd.f32 %v1155_v8, %v1154_v6 }
 0x137   : > { %v1148_v11 = vadd.f32 %v1147_v9, %v1146_v7  ;;  %v1157_v12 = vrot.slane %v1156_v10, 1 }
 0x139   : > { %1149 = vst [vmem:[%s238_s22] sm:$0x1] %v1148_v11  ;;  %v1158_v13 = vadd.f32 %v1157_v12, %v1156_v10 }
 0x13b   : > { %1159 = vst [vmem:[%s241_s25] sm:$0x1] %v1158_v13 }
 0x13c PF: > { %s16_s18 = sadd.s32 1, %s1624_s18  }
 0x13d   : > { %p13_p4 = scmp.ge.s32.totalorder %s16_s18, 4  }
 0x13f   :  { %15 = sbr.rel (!%p13_p4) target bundleno = 1 (0x1), region = 89 }

// kernel: patch_discriminator_forward.5
= control target key start
LH: loop header
LB: loop body
LE: loop exit
PB: predicated region body
PF: predicated region fallthrough
CT: control target
= control target key end

     0   :  { %s4165_s18 = smov 0   ;;  %s5153_s0 = inlined_call_operand.vmem [shape: bf16[2,6,6,128], index: 0, kind: input, shape index: {}]   ;;  %s5154_s1 = inlined_call_operand.vmem [shape: bf16[4,4,128,128], index: 1, kind: input, shape index: {}]   ;;  %s5155_s2 = inlined_call_operand.vmem [shape: f32[1,128], index: 2, kind: input, shape index: {}]   ;;  %s5156_s3 = inlined_call_operand.vmem [shape: f32[1,128], index: 3, kind: input, shape index: {}]   ;;  %s5157_s4 = inlined_call_operand.vmem [shape: f32[1,128], index: 4, kind: input, shape index: {}]   ;;  %s5158_s5 = inlined_call_operand.vmem [shape: f32[2,3,3,128], index: 5, kind: output, shape index: {}]  }
   0x1 LB: > { %s3113_s19 = sadd.s32 4294967295, %s4129_s18   ;;  %p3117_p0 = scmp.ge.s32.totalorder %s4129_s18, 1  ;;  %s4129_s18 = sphi %s4165_s18, %s15_s18  }
   0x2   : > { %p187_p1 = scmp.lt.s32.totalorder %s4129_s18, 3 }
   0x4   : > { %p188_p2 = pnand %p3117_p0, %p187_p1 }
   0x5   : > { %v3995_v0 = vld [vmem:[%s5154_s1 + $0x40] sm:$0xff] (!%p188_p2)   ;;  %v4131_v1 = vmov (!%p188_p2), 0.0   ;;  %v3997_v3 = vld [vmem:[%s5154_s1 + $0x48] sm:$0xff] (!%p188_p2)   ;;  %vm4132_vm0 = vmmov (!%p188_p2), 0   ;;  %p215_p3 = scmp.lt.s32.totalorder (!%p188_p2), %s3113_s19, 1  ;;  %v3999_v5 = vld [vmem:[%s5154_s1 + $0x50] sm:$0xff] (!%p188_p2)   ;;  %v282_v9 = vlaneseq (!%p188_p2) }
   0x6   : > { %191 = sbr.rel (%p188_p2) target bundleno = 507 (0x1fb), region = 40  ;;  %3661 = vmatprep.subr.bf16.mxu0 (!%p188_p2), %v4131_v1  ;;  %3681 = vmatprep.subr.bf16.mxu1 (!%p188_p2), %v4131_v1  ;;  %v3996_v2 = vld [vmem:[%s5154_s1] sm:$0xff] (!%p188_p2)   ;;  %v3998_v4 = vld [vmem:[%s5154_s1 + $0x8] sm:$0xff] (!%p188_p2)   ;;  %v4000_v6 = vld [vmem:[%s5154_s1 + $0x10] sm:$0xff] (!%p188_p2)   ;;  %v4133_v20 = vmov (!%p188_p2), 1966171168  }
   0x7   : > { %3662 = vmatpush3.bf16.msra.mxu0 (!%p188_p2), %v3995_v0  ;;  %3677 = vmatprep.mubr.msk.bf16.mxu0 (!%p188_p2), %vm4132_vm0, %v4131_v1  ;;  %v4001_v7 = vld [vmem:[%s5154_s1 + $0x58] sm:$0xff] (!%p188_p2)   ;;  %v4003_v10 = vld [vmem:[%s5154_s1 + $0x60] sm:$0xff] (!%p188_p2)   ;;  %v283_v12 = vshrl.u32 (!%p188_p2), %v282_v9, 7  ;;  %v4005_v16 = vld [vmem:[%s5154_s1 + $0x68] sm:$0xff] (!%p188_p2)   ;;  %v310_v21 = vunpack.c.l.s4 (!%p188_p2), %v4133_v20  ;;  %v4134_v34 = vmov (!%p188_p2), 0.0|0.0  }
   0x8   : > { %3682 = vmatpush3.bf16.msra.mxu1 (!%p188_p2), %v3996_v2  ;;  %3663 = vmatprep.subr.bf16.mxu0 (!%p188_p2), %v4131_v1  ;;  %v4002_v8 = vld [vmem:[%s5154_s1 + $0x18] sm:$0xff] (!%p188_p2)   ;;  %v4004_v11 = vld [vmem:[%s5154_s1 + $0x20] sm:$0xff] (!%p188_p2)   ;;  %v4006_v22 = vld [vmem:[%s5154_s1 + $0x28] sm:$0xff] (!%p188_p2)  }
   0x9   : > { %3683 = vmatprep.subr.bf16.mxu1 (!%p188_p2), %v4131_v1  ;;  %3697 = vmatprep.mubr.msk.bf16.mxu1 (!%p188_p2), %vm4132_vm0, %v4131_v1  ;;  %v4230_v15 = vld [vmem:[%s5156_s3] ss:$0 sm:$0xff] (!%p188_p2)  ;;  %vm284_vm1 = vcmp.ge.s32.totalorder (!%p188_p2), %v283_v12, 1  ;;  %vm287_vm2 = vcmp.lt.s32.totalorder (!%p188_p2), %v283_v12, 5  ;;  %v311_v25 = vunpack.c.0.s8 (!%p188_p2), %v310_v21  ;;  %v4007_v26 = vld [vmem:[%s5154_s1 + $0x70] sm:$0xff] (!%p188_p2)   ;;  %v4009_v38 = vld [vmem:[%s5154_s1 + $0x78] sm:$0xff] (!%p188_p2)  }
   0xa   : > { %v4238_v19 = vld [vmem:[%s5157_s4] ss:$0 sm:$0xff] (!%p188_p2)  ;;  %v4008_v29 = vld [vmem:[%s5154_s1 + $0x30] sm:$0xff] (!%p188_p2)   ;;  %vm4259_vm5 = vmand (!%p188_p2), %vm284_vm1, %vm287_vm2 }
   0xb   : > { %3664 = vmatpush3.bf16.msra.mxu0 (!%p188_p2), %v3997_v3  ;;  %v4255_v30 = vsub.s32 (!%p188_p2), %v311_v25, %v283_v12  ;;  %v4010_v39 = vld [vmem:[%s5154_s1 + $0x38] sm:$0xff] (!%p188_p2)   ;;  %v4029_v33 = vld [vmem:[%s5154_s1 + $0x108] sm:$0xff] (!%p188_p2)  }
   0xc   : > { %3684 = vmatpush3.bf16.msra.mxu1 (!%p188_p2), %v3998_v4  ;;  %3665 = vmatprep.subr.bf16.mxu0 (!%p188_p2), %v4131_v1 }
   0xd   : > { %s5162_s19 = smov (!%p215_p3, %s3113_s19), 1  ;;  %3685 = vmatprep.subr.bf16.mxu1 %v4131_v1  ;;  %v315_v35 = vrot.slane %v4134_v34, %v4255_v30 }
   0xe   : > { %s3981_s7 = smul.u32 24, %s5162_s19 }
   0xf   : > { %3666 = vmatpush3.bf16.msra.mxu0 %v3999_v5  ;;  %v316_v42 = vcombine.high %v315_v35, %v315_v35  ;;  %v4276_v43 = vrot.slane %v315_v35, %v4255_v30  ;;  %s3982_s9 = smul.u32 12, %s5162_s19 }
  0x10   : > { %3686 = vmatpush3.bf16.msra.mxu1 %v4000_v6  ;;  %3667 = vmatprep.subr.bf16.mxu0 %v4131_v1  ;;  %s4215_s14 = scalar_lea.vmem %s5153_s0, %s3981_s7 }
  0x11   : > { %3687 = vmatprep.subr.bf16.mxu1 %v4131_v1  ;;  %v227_v13 = vld [vmem:[%s4215_s14 + $0x4] sm:$0x7]  ;;  %v228_v14 = vld [vmem:[%s4215_s14 + $0x8] sm:$0x7]  ;;  %v4281_v46 = vrot.slane %v316_v42, %v4255_v30  ;;  %v376_v47 = vunpack.i.h.s16 %v4276_v43  ;;  %s224_s12 = scalar_lea.vmem %s5158_s5, %s3982_s9 }
  0x12   : > { %v233_v17 = vunpack.c.l.bf16 %v227_v13  ;;  %v234_v18 = vunpack.c.l.bf16 %v228_v14 }
  0x13   : > { %3668 = vmatpush3.bf16.msra.mxu0 %v4001_v7  ;;  %v4289_v53 = vunpack.i.h.s16 %v4281_v46  ;;  %v4296_v55 = vpack.i.b16 %v4281_v46, %v376_v47 }
  0x14   : > { %3688 = vmatpush3.bf16.msra.mxu1 %v4002_v8  ;;  %3669 = vmatprep.subr.bf16.mxu0 %v4131_v1  ;;  %v246_v23 = vmul.f32 %v4230_v15, %v233_v17  ;;  %v247_v24 = vmul.f32 %v4230_v15, %v234_v18 }
  0x15   : > { %3689 = vmatprep.subr.bf16.mxu1 %v4131_v1 }
  0x16   : > { %v259_v27 = vadd.f32 %v4238_v19, %v246_v23  ;;  %v260_v28 = vadd.f32 %v4238_v19, %v247_v24  ;;  %v4012_v24 = vld [vmem:[%s5154_s1 + $0xc0] sm:$0xff]  }
  0x17   : > { %3670 = vmatpush3.bf16.msra.mxu0 %v4003_v10  ;;  %v229_v10 = vld [vmem:[%s4215_s14 + $0xc] sm:$0x7] }
  0x18   : > { %3690 = vmatpush3.bf16.msra.mxu1 %v4004_v11  ;;  %3671 = vmatprep.subr.bf16.mxu0 %v4131_v1  ;;  %vm265_vm3 = vcmp.ge.f32.partialorder %v259_v27, 0.0  ;;  %vm266_vm4 = vcmp.ge.f32.partialorder %v260_v28, 0.0  ;;  %v271_v31 = vmul.f32 0.2, %v259_v27  ;;  %v272_v32 = vmul.f32 0.2, %v260_v28 }
  0x19   : > { %3691 = vmatprep.subr.bf16.mxu1 %v4131_v1  ;;  %v235_v17 = vunpack.c.l.bf16 %v229_v10 }
  0x1a   : > { %v277_v36 = vsel %vm265_vm3, %v259_v27, %v271_v31  ;;  %v278_v37 = vsel %vm266_vm4, %v260_v28, %v272_v32  ;;  %v4011_v27 = vld [vmem:[%s5154_s1 + $0x80] sm:$0xff]  }
  0x1b   : > { %3672 = vmatpush3.bf16.msra.mxu0 %v4005_v16  ;;  %v295_v40 = vsel %vm4259_vm5, %v277_v36, 0.0  ;;  %v296_v41 = vsel %vm4259_vm5, %v278_v37, 0.0  ;;  %v4014_v36 = vld [vmem:[%s5154_s1 + $0xc8] sm:$0xff]  }
  0x1c   : > { %3692 = vmatpush3.bf16.msra.mxu1 %v4006_v22  ;;  %3673 = vmatprep.subr.bf16.mxu0 %v4131_v1  ;;  %v301_v44 = vpack.c.bf16 %v295_v40, %v295_v40  ;;  %v302_v45 = vpack.c.bf16 %v296_v41, %v296_v41  ;;  %v248_v22 = vmul.f32 %v4230_v15, %v235_v17  ;;  %v4013_v41 = vld [vmem:[%s5154_s1 + $0x88] sm:$0xff]  }
  0x1d   : > { %3693 = vmatprep.subr.bf16.mxu1 %v4131_v1 }
  0x1e   : > { %v337_v48 = vrot.slane %v301_v44, %v4255_v30  ;;  %v359_v49 = vrot.slane %v302_v45, %v4255_v30  ;;  %v261_v31 = vadd.f32 %v4238_v19, %v248_v22 }
  0x1f   : > { %3674 = vmatpush3.bf16.msra.mxu0 %v4007_v26 }
  0x20   : > { %3694 = vmatpush3.bf16.msra.mxu1 %v4008_v29  ;;  %3675 = vmatprep.subr.bf16.mxu0 %v4131_v1  ;;  %v338_v50 = vcombine.high %v337_v48, %v337_v48  ;;  %v345_v51 = vrot.slane %v337_v48, %v4255_v30  ;;  %v360_v52 = vcombine.high %v359_v49, %v359_v49  ;;  %vm267_vm6 = vcmp.ge.f32.partialorder %v261_v31, 0.0 }
  0x21   : > { %3695 = vmatprep.subr.bf16.mxu1 %v4131_v1  ;;  %v4293_v54 = vrot.slane %v359_v49, %v4255_v30  ;;  %v4347_v29 = vcombine.high %v4276_v43, %v4276_v43  ;;  %v273_v37 = vmul.f32 0.2, %v261_v31 }
  0x22   : > { %v4299_v56 = vrot.slane %v338_v50, %v4255_v30  ;;  %v4302_v57 = vrot.slane %v360_v52, %v4255_v30  ;;  %v379_v58 = vunpack.i.h.s16 %v345_v51  ;;  %v3148_v59 = vpack.i.b16 %v345_v51, %v4281_v46 }
  0x23   : > { %3676 = vmatpush3.bf16.msra.mxu0 %v4009_v38  ;;  %v382_v60 = vunpack.i.h.s16 %v4293_v54  ;;  %v4350_v34 = vcombine.high %v345_v51, %v345_v51  ;;  %v4368_v42 = vcombine.high %v4293_v54, %v4293_v54  ;;  %v279_v44 = vsel %vm267_vm6, %v261_v31, %v273_v37 }
  0x24   : > { %3696 = vmatpush3.bf16.msra.mxu1 %v4010_v39  ;;  %3701 = vmatprep.subr.bf16.mxu0 %v4131_v1  ;;  %v4307_v61 = vunpack.i.h.s16 %v4302_v57  ;;  %v421_v62 = vpack.i.b16 %v379_v58, %v4289_v53  ;;  %v383_v63 = vunpack.i.l.s16 %v4302_v57  ;;  %v4312_v0 = vpack.i.b16 %v4299_v56, %v379_v58  ;;  %v4016_v58 = vld [vmem:[%s5154_s1 + $0xd0] sm:$0xff]  }
  0x25   : > { %3721 = vmatprep.subr.bf16.mxu1 %v4131_v1  ;;  %v4315_v2 = vpack.i.b16 %v4302_v57, %v382_v60  ;;  %v559_v3 = vcombine.low %v4276_v43, %v3148_v59  ;;  %v3226_v25 = vpack.i.b16 %v4293_v54, %v4299_v56  ;;  %v401_v28 = vunpack.i.h.s16 %v4299_v56 }
  0x26   : > { %v425_v4 = vcombine.low %v4296_v55, %v421_v62  ;;  %v560_v5 = vcombine.low %v4312_v0, %v4293_v54  ;;  %v581_v6 = vrot.slane %v383_v63, %v4255_v30  ;;  %v447_v8 = vrot.slane %v4307_v61, %v4255_v30  ;;  %v4015_v62 = vld [vmem:[%s5154_s1 + $0x90] sm:$0xff]  }
  0x27   : > { %v426_v7 = vcombine.low %v4299_v56, %v4315_v2  ;;  %v567_v9 = vrot.slane %v559_v3, %v4255_v30  ;;  %v4352_v35 = vcombine.low %v345_v51, %v3226_v25  ;;  %v4357_v38 = vpack.i.b16 %v382_v60, %v401_v28 }
  0x28   : > { %v433_v11 = vrot.slane %v425_v4, %v4255_v30  ;;  %v574_v12 = vrot.slane %v560_v5, %v4255_v30  ;;  %v596_v16 = vrot.slane %v581_v6, %v4255_v30  ;;  %v462_v20 = vrot.slane %v447_v8, %v4255_v30  ;;  %v4018_v6 = vld [vmem:[%s5154_s1 + $0xd8] sm:$0xff]  }
  0x29   : > { %v440_v13 = vrot.slane %v426_v7, %v4255_v30  ;;  %v3276_v39 = vpack.i.b16 %v4302_v57, %v4350_v34  ;;  %v848_v40 = vunpack.i.h.s16 %v4350_v34  ;;  %v847_v45 = vunpack.i.h.s16 %v4347_v29  ;;  %v4017_v8 = vld [vmem:[%s5154_s1 + $0x98] sm:$0xff]  }
  0x2a   : > { %v582_v14 = vcombine.low %v567_v9, %v574_v12  ;;  %v1202_v47 = vcombine.low %v4312_v0, %v4357_v38  ;;  %v4377_v48 = vpack.i.b16 %v4350_v34, %v401_v28  ;;  %v297_v49 = vsel %vm4259_vm5, %v279_v44, 0.0 }
  0x2b   : > { %v448_v18 = vcombine.low %v433_v11, %v440_v13  ;;  %v1355_v50 = vcombine.low %v4299_v56, %v3276_v39  ;;  %v4383_v51 = vpack.i.b16 %v4307_v61, %v848_v40  ;;  %v303_v52 = vpack.c.bf16 %v297_v49, %v297_v49  ;;  %v4022_v40 = vld [vmem:[%s5154_s1 + $0xe8] sm:$0xff]  }
  0x2c   : > { %v589_v21 = vrot.slane %v582_v14, %v4255_v30  ;;  %v3174_v59 = vpack.i.b16 %v4299_v56, %v4347_v29  ;;  %v4402_v0 = vpack.i.b16 %v4347_v29, %v4289_v53  ;;  %v868_v56 = vpack.i.b16 %v401_v28, %v847_v45  ;;  %v4019_v28 = vld [vmem:[%s5154_s1 + $0xa0] sm:$0xff]   ;;  %v4021_v49 = vld [vmem:[%s5154_s1 + $0xa8] sm:$0xff]  }
  0x2d   : > { %v455_v23 = vrot.slane %v448_v18, %v4255_v30  ;;  %v1508_v60 = vcombine.low %v4377_v48, %v4383_v51  ;;  %v1010_v63 = vrot.slane %v303_v52, %v4255_v30  ;;  %v4408_v3 = vpack.i.b16 %v4368_v42, %v4307_v61 }
  0x2e   : > { %v597_v26 = vcombine.low %v589_v21, %v596_v16  ;;  %v716_v7 = vcombine.low %v4281_v46, %v3174_v59  ;;  %v1058_v11 = vrot.slane %v4352_v35, %v4255_v30  ;;  %v849_v13 = vunpack.i.h.s16 %v4368_v42 }
  0x2f   : > { %v463_v32 = vcombine.low %v455_v23, %v462_v20  ;;  %v1011_v4 = vcombine.high %v1010_v63, %v1010_v63  ;;  %v4411_v5 = vrot.slane %v1010_v63, %v4255_v30  ;;  %v872_v14 = vcombine.low %v4402_v0, %v868_v56  ;;  %v4020_v23 = vld [vmem:[%s5154_s1 + $0xe0] sm:$0xff]   ;;  %v230_v63 = vld [vmem:[%s4215_s14 + $0x10] sm:$0x7] }
  0x30   : > { %3698 = vmatmul.mubr.bf16.vlgmr.msra.gmra.mrb[0].mxu1 %v597_v26  ;;  %v873_v16 = vcombine.low %v4350_v34, %v4408_v3  ;;  %v1363_v26 = vrot.slane %v1355_v50, %v4255_v30  ;;  %v4498_v51 = vrot.slane %v1508_v60, %v4255_v30  ;;  %v894_v59 = vrot.slane %v849_v13, %v4255_v30  ;;  %v4024_v60 = vld [vmem:[%s5154_s1 + $0xf0] sm:$0xff]  }
  0x31   : > { %3678 = vmatmul.mubr.bf16.vlgmr.msra.gmra.mrb[0].mxu0 %v463_v32  ;;  %3722 = vmatpush3.bf16.msra.mxu1 %v4012_v24  ;;  %v4422_v9 = vrot.slane %v1011_v4, %v4255_v30  ;;  %v1051_v10 = vcombine.low %v4315_v2, %v4411_v5  ;;  %v1027_v12 = vunpack.i.h.s16 %v4411_v5  ;;  %v3326_v17 = vpack.i.b16 %v4411_v5, %v4302_v57 }
  0x32   : > { %3702 = vmatpush3.bf16.msra.mxu0 %v4011_v27  ;;  %3723 = vmatprep.subr.bf16.mxu1 %v4131_v1  ;;  %v4445_v22 = vcombine.high %v4411_v5, %v4411_v5  ;;  %v717_v24 = vcombine.low %v4377_v48, %v4302_v57  ;;  %v880_v37 = vrot.slane %v872_v14, %v4255_v30 }
  0x33   : > { %3703 = vmatprep.subr.bf16.mxu0 %v4131_v1  ;;  %3717 = vmatprep.mubr.msk.bf16.mxu0 %vm4132_vm0, %v4131_v1  ;;  %v4437_v18 = vunpack.i.h.s16 %v4422_v9  ;;  %v1065_v20 = vrot.slane %v1051_v10, %v4255_v30  ;;  %v4441_v21 = vpack.i.b16 %v4422_v9, %v1027_v12  ;;  %v1356_v25 = vcombine.low %v4408_v3, %v4422_v9 }
  0x34   : > { %3737 = vmatprep.mubr.msk.bf16.mxu1 %vm4132_vm0, %v4131_v1  ;;  %v4456_v27 = vcombine.low %v4293_v54, %v3326_v17  ;;  %v4471_v54 = vrot.slane %v1202_v47, %v4255_v30  ;;  %v887_v38 = vrot.slane %v873_v16, %v4255_v30  ;;  %v731_v44 = vrot.slane %v717_v24, %v4255_v30  ;;  %v4026_v17 = vld [vmem:[%s5154_s1 + $0xf8] sm:$0xff]  }
  0x35   : > { %3724 = vmatpush3.bf16.msra.mxu1 %v4014_v36  ;;  %v4463_v31 = vpack.i.b16 %v4437_v18, %v849_v13  ;;  %v4465_v32 = vcombine.low %v1058_v11, %v1065_v20  ;;  %v1203_v34 = vcombine.low %v4302_v57, %v4441_v21  ;;  %v1370_v35 = vrot.slane %v1356_v25, %v4255_v30 }
  0x36   : > { %3704 = vmatpush3.bf16.msra.mxu0 %v4013_v41  ;;  %3725 = vmatprep.subr.bf16.mxu1 %v4131_v1  ;;  %v693_v36 = vunpack.i.l.s16 %v4368_v42  ;;  %v4479_v39 = vpack.i.b16 %v4445_v22, %v4437_v18  ;;  %v724_v41 = vrot.slane %v716_v7, %v4255_v30  ;;  %v236_v7 = vunpack.c.l.bf16 %v230_v63 }
  0x37   : > { %3705 = vmatprep.subr.bf16.mxu0 %v4131_v1  ;;  %v4487_v47 = vrot.slane %v1203_v34, %v4255_v30  ;;  %v4489_v48 = vcombine.low %v1363_v26, %v1370_v35  ;;  %v3376_v11 = vpack.i.b16 %v4422_v9, %v4368_v42  ;;  %v909_v14 = vrot.slane %v894_v59, %v4255_v30  ;;  %v4028_v26 = vld [vmem:[%s5154_s1 + $0x140] sm:$0xff]   ;;  %v4031_v59 = vld [vmem:[%s5154_s1 + $0x110] sm:$0xff]  }
  0x38   : > { %v1509_v50 = vcombine.low %v4368_v42, %v4479_v39  ;;  %v738_v4 = vrot.slane %v693_v36, %v4255_v30  ;;  %v4030_v36 = vld [vmem:[%s5154_s1 + $0x148] sm:$0xff]  }
  0x39   : > { %3726 = vmatpush3.bf16.msra.mxu1 %v4016_v58  ;;  %v1225_v52 = vcombine.low %v4471_v54, %v4487_v47  ;;  %v4504_v58 = vpack.i.b16 %v1027_v12, %v4307_v61  ;;  %v249_v12 = vmul.f32 %v4230_v15, %v236_v7  ;;  %v4532_v16 = vcombine.low %v4302_v57, %v3376_v11  ;;  %v4041_v54 = vld [vmem:[%s5154_s1 + $0x138] sm:$0xff]  }
  0x3a   : > { %3706 = vmatpush3.bf16.msra.mxu0 %v4015_v62  ;;  %3727 = vmatprep.subr.bf16.mxu1 %v4131_v1  ;;  %v895_v62 = vcombine.low %v880_v37, %v887_v38  ;;  %v4509_v56 = vrot.slane %v1509_v50, %v4255_v30  ;;  %v753_v20 = vrot.slane %v738_v4, %v4255_v30 }
  0x3b   : > { %3707 = vmatprep.subr.bf16.mxu0 %v4131_v1  ;;  %v1837_v61 = vcombine.low %v4315_v2, %v4504_v58  ;;  %v2143_v2 = vcombine.low %v4408_v3, %v4463_v31  ;;  %v262_v15 = vadd.f32 %v4238_v19, %v249_v12  ;;  %v4027_v19 = vld [vmem:[%s5154_s1 + $0x100] sm:$0xff]   ;;  %v1693_v50 = vrot.slane %v4456_v27, %v4255_v30 }
  0x3c   : > { %v1531_v10 = vcombine.low %v4498_v51, %v4509_v56  ;;  %v902_v13 = vrot.slane %v895_v62, %v4255_v30  ;;  %v1486_v62 = vunpack.i.h.s16 %v4445_v22  ;;  %v1998_v11 = vrot.slane %v4532_v16, %v4255_v30  ;;  %v4033_v16 = vld [vmem:[%s5154_s1 + $0x118] sm:$0xff]   ;;  %v4035_v3 = vld [vmem:[%s5154_s1 + $0x120] sm:$0xff]  }
  0x3d   : > { %3728 = vmatpush3.bf16.msra.mxu1 %v4018_v6  ;;  %v739_v6 = vcombine.low %v724_v41, %v731_v44  ;;  %vm268_vm7 = vcmp.ge.f32.partialorder %v262_v15, 0.0  ;;  %v274_v57 = vmul.f32 0.2, %v262_v15  ;;  %v4032_v41 = vld [vmem:[%s5154_s1 + $0x150] sm:$0xff]   ;;  %v1845_v63 = vrot.slane %v1837_v61, %v4255_v30  ;;  %v4057_v51 = vld [vmem:[%s5154_s1 + $0x1b8] sm:$0xff]  }
  0x3e   : > { %3708 = vmatpush3.bf16.msra.mxu0 %v4017_v8  ;;  %3729 = vmatprep.subr.bf16.mxu1 %v4131_v1  ;;  %v4023_v8 = vld [vmem:[%s5154_s1 + $0xb0] sm:$0xff]   ;;  %v910_v24 = vcombine.low %v902_v13, %v909_v14  ;;  %v4034_v13 = vld [vmem:[%s5154_s1 + $0x158] sm:$0xff]  }
  0x3f   : > { %3709 = vmatprep.subr.bf16.mxu0 %v4131_v1  ;;  %v746_v42 = vrot.slane %v739_v6, %v4255_v30 }
  0x41   : > { %3730 = vmatpush3.bf16.msra.mxu1 %v4020_v23  ;;  %v4025_v23 = vld [vmem:[%s5154_s1 + $0xb8] sm:$0xff]   ;;  %v754_v25 = vcombine.low %v746_v42, %v753_v20 }
  0x42   : > { %3710 = vmatpush3.bf16.msra.mxu0 %v4019_v28  ;;  %3731 = vmatprep.subr.bf16.mxu1 %v4131_v1  ;;  %v280_v28 = vsel %vm268_vm7, %v262_v15, %v274_v57 }
  0x43   : > { %3711 = vmatprep.subr.bf16.mxu0 %v4131_v1  ;;  %v298_v34 = vsel %vm4259_vm5, %v280_v28, 0.0 }
  0x44   : > { %v304_v35 = vpack.c.bf16 %v298_v34, %v298_v34 }
  0x45   : > { %3732 = vmatpush3.bf16.msra.mxu1 %v4022_v40 }
  0x46   : > { %3712 = vmatpush3.bf16.msra.mxu0 %v4021_v49  ;;  %3733 = vmatprep.subr.bf16.mxu1 %v4131_v1  ;;  %v1646_v37 = vrot.slane %v304_v35, %v4255_v30 }
  0x47   : > { %3713 = vmatprep.subr.bf16.mxu0 %v4131_v1 }
  0x48   : > { %v1647_v38 = vcombine.high %v1646_v37, %v1646_v37  ;;  %v4567_v40 = vrot.slane %v1646_v37, %v4255_v30  ;;  %v4036_v37 = vld [vmem:[%s5154_s1 + $0x160] sm:$0xff]  }
  0x49   : > { %3734 = vmatpush3.bf16.msra.mxu1 %v4024_v60 }
  0x4a   : > { %3714 = vmatpush3.bf16.msra.mxu0 %v4023_v8  ;;  %3735 = vmatprep.subr.bf16.mxu1 %v4131_v1  ;;  %v4575_v44 = vrot.slane %v1647_v38, %v4255_v30  ;;  %v1686_v49 = vcombine.low %v4441_v21, %v4567_v40  ;;  %v1663_v58 = vunpack.i.h.s16 %v4567_v40  ;;  %v4590_v60 = vcombine.high %v4567_v40, %v4567_v40 }
  0x4b   : > { %3715 = vmatprep.subr.bf16.mxu0 %v4131_v1 }
  0x4c   : > { %v1816_v27 = vunpack.i.h.s16 %v4575_v44  ;;  %v1664_v4 = vunpack.i.l.s16 %v4575_v44  ;;  %v1700_v6 = vrot.slane %v1686_v49, %v4255_v30  ;;  %v4599_v7 = vpack.i.b16 %v4575_v44, %v1663_v58 }
  0x4d   : > { %3736 = vmatpush3.bf16.msra.mxu1 %v4026_v17  ;;  %v1969_v8 = vunpack.i.l.s16 %v4590_v60  ;;  %v1991_v61 = vcombine.low %v4479_v39, %v4575_v44  ;;  %v2121_v12 = vunpack.i.h.s16 %v4590_v60 }
  0x4e   : > { %3716 = vmatpush3.bf16.msra.mxu0 %v4025_v23  ;;  %3761 = vmatprep.subr.bf16.mxu1 %v4131_v1  ;;  %v4612_v14 = vpack.i.b16 %v1816_v27, %v1486_v62  ;;  %v1707_v17 = vrot.slane %v1664_v4, %v4255_v30  ;;  %v1708_v42 = vcombine.low %v1693_v50, %v1700_v6 }
  0x4f   : > { %3741 = vmatprep.subr.bf16.mxu0 %v4131_v1  ;;  %v1838_v20 = vcombine.low %v4422_v9, %v4599_v7  ;;  %v1859_v15 = vrot.slane %v1816_v27, %v4255_v30  ;;  %v2005_v23 = vrot.slane %v1991_v61, %v4255_v30  ;;  %v2012_v57 = vrot.slane %v1969_v8, %v4255_v30  ;;  %v4037_v61 = vld [vmem:[%s5154_s1 + $0x128] sm:$0xff]  }
  0x50   : > { %3738 = vmatmul.mubr.bf16.vlgmr.msra.gmra.mrb[4].mxu1 %v910_v24  ;;  %v1715_v24 = vrot.slane %v1708_v42, %v4255_v30  ;;  %v4629_v28 = vpack.i.b16 %v4590_v60, %v1816_v27  ;;  %v2165_v49 = vrot.slane %v2121_v12, %v4255_v30  ;;  %v1028_v27 = vunpack.i.l.s16 %v4422_v9 }
  0x51   : > { %3718 = vmatmul.mubr.bf16.vlgmr.msra.gmra.mrb[4].mxu0 %v754_v25  ;;  %3762 = vmatpush3.bf16.msra.mxu1 %v4028_v26  ;;  %v1722_v25 = vrot.slane %v1707_v17, %v4255_v30  ;;  %v1852_v26 = vrot.slane %v1838_v20, %v4255_v30  ;;  %v2013_v34 = vcombine.low %v1998_v11, %v2005_v23 }
  0x52   : > { %3742 = vmatpush3.bf16.msra.mxu0 %v4027_v19  ;;  %3763 = vmatprep.subr.bf16.mxu1 %v4131_v1  ;;  %v4632_v19 = vrot.slane %v1859_v15, %v4255_v30  ;;  %v2027_v35 = vrot.slane %v2012_v57, %v4255_v30  ;;  %v2180_v8 = vrot.slane %v2165_v49, %v4255_v30  ;;  %v4039_v15 = vld [vmem:[%s5154_s1 + $0x130] sm:$0xff]  }
  0x53   : > { %3743 = vmatprep.subr.bf16.mxu0 %v4131_v1  ;;  %3757 = vmatprep.mubr.msk.bf16.mxu0 %vm4132_vm0, %v4131_v1  ;;  %v1860_v38 = vcombine.low %v1845_v63, %v1852_v26  ;;  %v2020_v31 = vrot.slane %v2013_v34, %v4255_v30  ;;  %v4038_v63 = vld [vmem:[%s5154_s1 + $0x168] sm:$0xff]   ;;  %v1224_v12 = vrot.slane %v4437_v18, %v4255_v30  ;;  %v4047_v49 = vld [vmem:[%s5154_s1 + $0x190] sm:$0xff]  }
  0x54   : > { %3777 = vmatprep.mubr.msk.bf16.mxu1 %vm4132_vm0, %v4131_v1  ;;  %v1072_v17 = vrot.slane %v1028_v27, %v4255_v30  ;;  %v3426_v20 = vpack.i.b16 %v4567_v40, %v4422_v9  ;;  %v2321_v57 = vcombine.low %v4599_v7, %v4276_v43  ;;  %v2473_v40 = vcombine.low %v4575_v44, %v4296_v55  ;;  %v4042_v43 = vld [vmem:[%s5154_s1 + $0x178] sm:$0xff]   ;;  %v4053_v27 = vld [vmem:[%s5154_s1 + $0x1a8] sm:$0xff]  }
  0x55   : > { %3764 = vmatpush3.bf16.msra.mxu1 %v4030_v36  ;;  %v2151_v36 = vrot.slane %v2143_v2, %v4255_v30  ;;  %v4654_v2 = vrot.slane %v1860_v38, %v4255_v30  ;;  %v4045_v38 = vld [vmem:[%s5154_s1 + $0x188] sm:$0xff]  }
  0x56   : > { %3744 = vmatpush3.bf16.msra.mxu0 %v4029_v33  ;;  %3765 = vmatprep.subr.bf16.mxu1 %v4131_v1  ;;  %v4642_v33 = vcombine.low %v1715_v24, %v1722_v25  ;;  %v2320_v23 = vcombine.low %v4411_v5, %v3426_v20  ;;  %v1239_v25 = vrot.slane %v1224_v12, %v4255_v30  ;;  %v4056_v12 = vld [vmem:[%s5154_s1 + $0x1f0] sm:$0xff]  }
  0x57   : > { %3745 = vmatprep.subr.bf16.mxu0 %v4131_v1  ;;  %v1875_v4 = vcombine.low %v4654_v2, %v4632_v19  ;;  %v1087_v5 = vrot.slane %v1072_v17, %v4255_v30  ;;  %v2335_v55 = vrot.slane %v2321_v57, %v4255_v30  ;;  %v4717_v47 = vrot.slane %v2473_v40, %v4255_v30  ;;  %v4055_v17 = vld [vmem:[%s5154_s1 + $0x1b0] sm:$0xff]   ;;  %v4059_v40 = vld [vmem:[%s5154_s1 + $0x200] sm:$0xff]   ;;  %v4082_v2 = vld [vmem:[%s5154_s1 + $0x2d8] sm:$0xff]  }
  0x58   : > { %v4080_v19 = vld [vmem:[%s5154_s1 + $0x2d0] sm:$0xff]  }
  0x59   : > { %3766 = vmatpush3.bf16.msra.mxu1 %v4032_v41  ;;  %v2144_v41 = vcombine.low %v4445_v22, %v4629_v28 }
  0x5a   : > { %3746 = vmatpush3.bf16.msra.mxu0 %v4031_v59  ;;  %3767 = vmatprep.subr.bf16.mxu1 %v4131_v1  ;;  %v4657_v59 = vcombine.low %v2020_v31, %v2027_v35  ;;  %v4044_v35 = vld [vmem:[%s5154_s1 + $0x1c0] sm:$0xff]   ;;  %v4049_v31 = vld [vmem:[%s5154_s1 + $0x198] sm:$0xff]  }
  0x5b   : > { %3747 = vmatprep.subr.bf16.mxu0 %v4131_v1  ;;  %v2158_v50 = vrot.slane %v2144_v41, %v4255_v30  ;;  %v4048_v41 = vld [vmem:[%s5154_s1 + $0x1d0] sm:$0xff]  }
  0x5d   : > { %3768 = vmatpush3.bf16.msra.mxu1 %v4034_v13  ;;  %v2166_v6 = vcombine.low %v2151_v36, %v2158_v50  ;;  %v4040_v13 = vld [vmem:[%s5154_s1 + $0x170] sm:$0xff]   ;;  %v4043_v36 = vld [vmem:[%s5154_s1 + $0x180] sm:$0xff]  }
  0x5e   : > { %3748 = vmatpush3.bf16.msra.mxu0 %v4033_v16  ;;  %3769 = vmatprep.subr.bf16.mxu1 %v4131_v1  ;;  %v2469_v16 = vpack.i.b16 %v1663_v58, %v4437_v18  ;;  %v1080_v18 = vrot.slane %v4465_v32, %v4255_v30  ;;  %v1232_v58 = vrot.slane %v1225_v52, %v4255_v30  ;;  %v4051_v50 = vld [vmem:[%s5154_s1 + $0x1a0] sm:$0xff]  }
  0x5f   : > { %3749 = vmatprep.subr.bf16.mxu0 %v4131_v1  ;;  %v2173_v11 = vrot.slane %v2166_v6, %v4255_v30  ;;  %v4054_v6 = vld [vmem:[%s5154_s1 + $0x1e8] sm:$0xff]  }
  0x60   : > { %v2472_v24 = vcombine.low %v4441_v21, %v2469_v16  ;;  %v2328_v21 = vrot.slane %v2320_v23, %v4255_v30  ;;  %v1240_v7 = vcombine.low %v1232_v58, %v1239_v25  ;;  %v1088_v34 = vcombine.low %v1080_v18, %v1087_v5  ;;  %v4062_v18 = vld [vmem:[%s5154_s1 + $0x248] sm:$0xff]   ;;  %v4064_v25 = vld [vmem:[%s5154_s1 + $0x250] sm:$0xff]   ;;  %v4066_v5 = vld [vmem:[%s5154_s1 + $0x258] sm:$0xff]  }
  0x61   : > { %3770 = vmatpush3.bf16.msra.mxu1 %v4036_v37  ;;  %v4678_v42 = vcombine.low %v2173_v11, %v2180_v8  ;;  %v4046_v37 = vld [vmem:[%s5154_s1 + $0x1c8] sm:$0xff]   ;;  %v1334_v8 = vunpack.i.l.s16 %v4445_v22  ;;  %v1530_v11 = vrot.slane %v1486_v62, %v4255_v30  ;;  %v2626_v62 = vcombine.low %v4629_v28, %v4281_v46 }
  0x62   : > { %3750 = vmatpush3.bf16.msra.mxu0 %v4035_v3  ;;  %3771 = vmatprep.subr.bf16.mxu1 %v4131_v1  ;;  %v4710_v32 = vrot.slane %v2472_v24, %v4255_v30  ;;  %v4720_v52 = vcombine.low %v2328_v21, %v2335_v55  ;;  %v4050_v3 = vld [vmem:[%s5154_s1 + $0x1d8] sm:$0xff]   ;;  %v2778_v16 = vcombine.low %v4479_v39, %v4612_v14  ;;  %v4060_v24 = vld [vmem:[%s5154_s1 + $0x240] sm:$0xff]   ;;  %v4061_v58 = vld [vmem:[%s5154_s1 + $0x208] sm:$0xff]  }
  0x63   : > { %3751 = vmatprep.subr.bf16.mxu0 %v4131_v1  ;;  %v1545_v23 = vrot.slane %v1530_v11, %v4255_v30  ;;  %v1385_v39 = vrot.slane %v4489_v48, %v4255_v30  ;;  %v4065_v21 = vld [vmem:[%s5154_s1 + $0x218] sm:$0xff]   ;;  %v4068_v55 = vld [vmem:[%s5154_s1 + $0x260] sm:$0xff]  }
  0x64   : > { %v2495_v26 = vcombine.low %v4710_v32, %v4717_v47  ;;  %v4090_v11 = vld [vmem:[%s5154_s1 + $0x2f8] sm:$0xff]  }
  0x65   : > { %3772 = vmatpush3.bf16.msra.mxu1 %v4038_v63  ;;  %v4052_v63 = vld [vmem:[%s5154_s1 + $0x1e0] sm:$0xff]   ;;  %v4105_v32 = vld [vmem:[%s5154_s1 + $0x338] sm:$0xff]  }
  0x66   : > { %3752 = vmatpush3.bf16.msra.mxu0 %v4037_v61  ;;  %3773 = vmatprep.subr.bf16.mxu1 %v4131_v1  ;;  %v1377_v61 = vrot.slane %v1334_v8, %v4255_v30  ;;  %v4088_v8 = vld [vmem:[%s5154_s1 + $0x2f0] sm:$0xff]  }
  0x67   : > { %3753 = vmatprep.subr.bf16.mxu0 %v4131_v1 }
  0x69   : > { %3774 = vmatpush3.bf16.msra.mxu1 %v4040_v13  ;;  %v3476_v13 = vpack.i.b16 %v4575_v44, %v4445_v22  ;;  %v2779_v22 = vcombine.low %v4590_v60, %v4402_v0  ;;  %v1392_v44 = vrot.slane %v1377_v61, %v4255_v30  ;;  %v2640_v0 = vrot.slane %v2626_v62, %v4255_v30  ;;  %v4087_v61 = vld [vmem:[%s5154_s1 + $0x2b0] sm:$0xff]   ;;  %v4093_v62 = vld [vmem:[%s5154_s1 + $0x308] sm:$0xff]  }
  0x6a   : > { %3754 = vmatpush3.bf16.msra.mxu0 %v4039_v15  ;;  %3775 = vmatprep.subr.bf16.mxu1 %v4131_v1  ;;  %v1538_v15 = vrot.slane %v1531_v10, %v4255_v30  ;;  %v4812_v60 = vrot.slane %v2778_v16, %v4255_v30  ;;  %v4098_v16 = vld [vmem:[%s5154_s1 + $0x358] sm:$0xff]  }
  0x6b   : > { %3755 = vmatprep.subr.bf16.mxu0 %v4131_v1  ;;  %v2625_v20 = vcombine.low %v4422_v9, %v3476_v13  ;;  %v4058_v9 = vld [vmem:[%s5154_s1 + $0x1f8] sm:$0xff]   ;;  %v4819_v56 = vrot.slane %v2779_v22, %v4255_v30  ;;  %v1393_v57 = vcombine.low %v1385_v39, %v1392_v44  ;;  %v4092_v13 = vld [vmem:[%s5154_s1 + $0x340] sm:$0xff]   ;;  %v4101_v39 = vld [vmem:[%s5154_s1 + $0x328] sm:$0xff]  }
  0x6c   : > { %v1546_v10 = vcombine.low %v1538_v15, %v1545_v23  ;;  %v4097_v22 = vld [vmem:[%s5154_s1 + $0x318] sm:$0xff]   ;;  %v4100_v44 = vld [vmem:[%s5154_s1 + $0x360] sm:$0xff]   ;;  %v4102_v23 = vld [vmem:[%s5154_s1 + $0x368] sm:$0xff]  }
  0x6d   : > { %3776 = vmatpush3.bf16.msra.mxu1 %v4042_v43  ;;  %v2633_v14 = vrot.slane %v2625_v20, %v4255_v30  ;;  %v2801_v28 = vcombine.low %v4812_v60, %v4819_v56  ;;  %v4063_v43 = vld [vmem:[%s5154_s1 + $0x210] sm:$0xff]   ;;  %v4094_v20 = vld [vmem:[%s5154_s1 + $0x348] sm:$0xff]   ;;  %v4099_v15 = vld [vmem:[%s5154_s1 + $0x320] sm:$0xff]  }
  0x6e   : > { %3756 = vmatpush3.bf16.msra.mxu0 %v4041_v54  ;;  %3801 = vmatprep.subr.bf16.mxu1 %v4131_v1  ;;  %v4067_v54 = vld [vmem:[%s5154_s1 + $0x220] sm:$0xff]   ;;  %v4121_v60 = vld [vmem:[%s5154_s1 + $0x3b8] sm:$0xff]  }
  0x6f   : > { %3781 = vmatprep.subr.bf16.mxu0 %v4131_v1  ;;  %v4822_v48 = vcombine.low %v2633_v14, %v2640_v0  ;;  %v2494_v14 = vrot.slane %v4289_v53, %v4255_v30  ;;  %v4104_v0 = vld [vmem:[%s5154_s1 + $0x370] sm:$0xff]   ;;  %v2502_v53 = vrot.slane %v2495_v26, %v4255_v30 }
  0x70   : > { %3778 = vmatmul.mubr.bf16.vlgmr.msra.gmra.mrb[8].mxu1 %v1240_v7  ;;  %v4070_v7 = vld [vmem:[%s5154_s1 + $0x268] sm:$0xff]  }
  0x71   : > { %3758 = vmatmul.mubr.bf16.vlgmr.msra.gmra.mrb[8].mxu0 %v1088_v34  ;;  %3802 = vmatpush3.bf16.msra.mxu1 %v4044_v35  ;;  %v4069_v34 = vld [vmem:[%s5154_s1 + $0x228] sm:$0xff]   ;;  %v4072_v35 = vld [vmem:[%s5154_s1 + $0x270] sm:$0xff]  }
  0x72   : > { %3782 = vmatpush3.bf16.msra.mxu0 %v4043_v36  ;;  %3803 = vmatprep.subr.bf16.mxu1 %v4131_v1  ;;  %v4071_v36 = vld [vmem:[%s5154_s1 + $0x230] sm:$0xff]  }
  0x73   : > { %3783 = vmatprep.subr.bf16.mxu0 %v4131_v1  ;;  %3797 = vmatprep.mubr.msk.bf16.mxu0 %vm4132_vm0, %v4131_v1 }
  0x74   : > { %3817 = vmatprep.mubr.msk.bf16.mxu1 %vm4132_vm0, %v4131_v1 }
  0x75   : > { %3804 = vmatpush3.bf16.msra.mxu1 %v4046_v37  ;;  %v4074_v37 = vld [vmem:[%s5154_s1 + $0x278] sm:$0xff]  }
  0x76   : > { %3784 = vmatpush3.bf16.msra.mxu0 %v4045_v38  ;;  %3805 = vmatprep.subr.bf16.mxu1 %v4131_v1  ;;  %v4073_v38 = vld [vmem:[%s5154_s1 + $0x238] sm:$0xff]  }
  0x77   : > { %3785 = vmatprep.subr.bf16.mxu0 %v4131_v1 }
  0x79   : > { %3806 = vmatpush3.bf16.msra.mxu1 %v4048_v41  ;;  %v4076_v41 = vld [vmem:[%s5154_s1 + $0x2c0] sm:$0xff]  }
  0x7a   : > { %3786 = vmatpush3.bf16.msra.mxu0 %v4047_v49  ;;  %3807 = vmatprep.subr.bf16.mxu1 %v4131_v1  ;;  %v4075_v49 = vld [vmem:[%s5154_s1 + $0x280] sm:$0xff]  }
  0x7b   : > { %3787 = vmatprep.subr.bf16.mxu0 %v4131_v1 }
  0x7d   : > { %3808 = vmatpush3.bf16.msra.mxu1 %v4050_v3  ;;  %v4078_v3 = vld [vmem:[%s5154_s1 + $0x2c8] sm:$0xff]  }
  0x7e   : > { %3788 = vmatpush3.bf16.msra.mxu0 %v4049_v31  ;;  %3809 = vmatprep.subr.bf16.mxu1 %v4131_v1  ;;  %v4077_v31 = vld [vmem:[%s5154_s1 + $0x288] sm:$0xff]  }
  0x7f   : > { %3789 = vmatprep.subr.bf16.mxu0 %v4131_v1 }
  0x81   : > { %3810 = vmatpush3.bf16.msra.mxu1 %v4052_v63  ;;  %v4083_v63 = vld [vmem:[%s5154_s1 + $0x2a0] sm:$0xff]  }
  0x82   : > { %3790 = vmatpush3.bf16.msra.mxu0 %v4051_v50  ;;  %3811 = vmatprep.subr.bf16.mxu1 %v4131_v1  ;;  %v4084_v50 = vld [vmem:[%s5154_s1 + $0x2e0] sm:$0xff]  }
  0x83   : > { %3791 = vmatprep.subr.bf16.mxu0 %v4131_v1 }
  0x85   : > { %3812 = vmatpush3.bf16.msra.mxu1 %v4054_v6  ;;  %v4085_v6 = vld [vmem:[%s5154_s1 + $0x2a8] sm:$0xff]  }
  0x86   : > { %3792 = vmatpush3.bf16.msra.mxu0 %v4053_v27  ;;  %3813 = vmatprep.subr.bf16.mxu1 %v4131_v1  ;;  %v4086_v27 = vld [vmem:[%s5154_s1 + $0x2e8] sm:$0xff]  }
  0x87   : > { %3793 = vmatprep.subr.bf16.mxu0 %v4131_v1 }
  0x89   : > { %3814 = vmatpush3.bf16.msra.mxu1 %v4056_v12  ;;  %v4089_v12 = vld [vmem:[%s5154_s1 + $0x2b8] sm:$0xff]  }
  0x8a   : > { %3794 = vmatpush3.bf16.msra.mxu0 %v4055_v17  ;;  %3815 = vmatprep.subr.bf16.mxu1 %v4131_v1  ;;  %v4091_v17 = vld [vmem:[%s5154_s1 + $0x300] sm:$0xff]  }
  0x8b   : > { %3795 = vmatprep.subr.bf16.mxu0 %v4131_v1 }
  0x8d   : > { %3816 = vmatpush3.bf16.msra.mxu1 %v4058_v9  ;;  %v2299_v9 = vunpack.i.l.s16 %v4281_v46  ;;  %v4103_v46 = vld [vmem:[%s5154_s1 + $0x330] sm:$0xff]  }
  0x8e   : > { %3796 = vmatpush3.bf16.msra.mxu0 %v4057_v51  ;;  %3841 = vmatprep.subr.bf16.mxu1 %v4131_v1 }
  0x8f   : > { %3821 = vmatprep.subr.bf16.mxu0 %v4131_v1  ;;  %v2342_v51 = vrot.slane %v2299_v9, %v4255_v30 }
  0x90   : > { %3818 = vmatmul.mubr.bf16.vlgmr.msra.gmra.mrb[12].mxu1 %v1546_v10  ;;  %v2509_v10 = vrot.slane %v2494_v14, %v4255_v30 }
  0x91   : > { %3798 = vmatmul.mubr.bf16.vlgmr.msra.gmra.mrb[12].mxu0 %v1393_v57  ;;  %3842 = vmatpush3.bf16.msra.mxu1 %v4060_v24  ;;  %v4106_v57 = vld [vmem:[%s5154_s1 + $0x378] sm:$0xff]   ;;  %v2350_v24 = vrot.slane %v4720_v52, %v4255_v30  ;;  %v4107_v52 = vld [vmem:[%s5154_s1 + $0x380] sm:$0xff]  }
  0x92   : > { %3822 = vmatpush3.bf16.msra.mxu0 %v4059_v40  ;;  %3843 = vmatprep.subr.bf16.mxu1 %v4131_v1  ;;  %v2357_v40 = vrot.slane %v2342_v51, %v4255_v30  ;;  %v2510_v47 = vcombine.low %v2502_v53, %v2509_v10 }
  0x93   : > { %3823 = vmatprep.subr.bf16.mxu0 %v4131_v1  ;;  %3837 = vmatprep.mubr.msk.bf16.mxu0 %vm4132_vm0, %v4131_v1 }
  0x94   : > { %3857 = vmatprep.mubr.msk.bf16.mxu1 %vm4132_vm0, %v4131_v1  ;;  %v2358_v26 = vcombine.low %v2350_v24, %v2357_v40 }
  0x95   : > { %3844 = vmatpush3.bf16.msra.mxu1 %v4062_v18  ;;  %v4108_v18 = vld [vmem:[%s5154_s1 + $0x3c0] sm:$0xff]  }
  0x96   : > { %3824 = vmatpush3.bf16.msra.mxu0 %v4061_v58  ;;  %3845 = vmatprep.subr.bf16.mxu1 %v4131_v1  ;;  %v4110_v58 = vld [vmem:[%s5154_s1 + $0x3c8] sm:$0xff]  }
  0x97   : > { %3825 = vmatprep.subr.bf16.mxu0 %v4131_v1 }
  0x99   : > { %3846 = vmatpush3.bf16.msra.mxu1 %v4064_v25  ;;  %v4109_v25 = vld [vmem:[%s5154_s1 + $0x388] sm:$0xff]  }
  0x9a   : > { %3826 = vmatpush3.bf16.msra.mxu0 %v4063_v43  ;;  %3847 = vmatprep.subr.bf16.mxu1 %v4131_v1  ;;  %v4112_v43 = vld [vmem:[%s5154_s1 + $0x3d0] sm:$0xff]  }
  0x9b   : > { %3827 = vmatprep.subr.bf16.mxu0 %v4131_v1 }
  0x9d   : > { %3848 = vmatpush3.bf16.msra.mxu1 %v4066_v5  ;;  %v4111_v5 = vld [vmem:[%s5154_s1 + $0x390] sm:$0xff]  }
  0x9e   : > { %3828 = vmatpush3.bf16.msra.mxu0 %v4065_v21  ;;  %3849 = vmatprep.subr.bf16.mxu1 %v4131_v1  ;;  %v4114_v21 = vld [vmem:[%s5154_s1 + $0x3d8] sm:$0xff]  }
  0x9f   : > { %3829 = vmatprep.subr.bf16.mxu0 %v4131_v1 }
  0xa1   : > { %3850 = vmatpush3.bf16.msra.mxu1 %v4068_v55  ;;  %v4113_v55 = vld [vmem:[%s5154_s1 + $0x398] sm:$0xff]  }
  0xa2   : > { %3830 = vmatpush3.bf16.msra.mxu0 %v4067_v54  ;;  %3851 = vmatprep.subr.bf16.mxu1 %v4131_v1  ;;  %v4116_v54 = vld [vmem:[%s5154_s1 + $0x3e0] sm:$0xff]  }
  0xa3   : > { %3831 = vmatprep.subr.bf16.mxu0 %v4131_v1 }
  0xa5   : > { %3852 = vmatpush3.bf16.msra.mxu1 %v4070_v7  ;;  %v4115_v7 = vld [vmem:[%s5154_s1 + $0x3a0] sm:$0xff]  }
  0xa6   : > { %3832 = vmatpush3.bf16.msra.mxu0 %v4069_v34  ;;  %3853 = vmatprep.subr.bf16.mxu1 %v4131_v1  ;;  %v4118_v34 = vld [vmem:[%s5154_s1 + $0x3e8] sm:$0xff]  }
  0xa7   : > { %3833 = vmatprep.subr.bf16.mxu0 %v4131_v1 }
  0xa9   : > { %3854 = vmatpush3.bf16.msra.mxu1 %v4072_v35  ;;  %v2604_v35 = vunpack.i.l.s16 %v4347_v29  ;;  %v4119_v29 = vld [vmem:[%s5154_s1 + $0x3b0] sm:$0xff]  }
  0xaa   : > { %3834 = vmatpush3.bf16.msra.mxu0 %v4071_v36  ;;  %3855 = vmatprep.subr.bf16.mxu1 %v4131_v1  ;;  %v4117_v36 = vld [vmem:[%s5154_s1 + $0x3a8] sm:$0xff]  }
  0xab   : > { %3835 = vmatprep.subr.bf16.mxu0 %v4131_v1 }
  0xad   : > { %3856 = vmatpush3.bf16.msra.mxu1 %v4074_v37 }
  0xae   : > { %3836 = vmatpush3.bf16.msra.mxu0 %v4073_v38  ;;  %3881 = vmatprep.subr.bf16.mxu1 %v4131_v1 }
  0xaf   : > { %3861 = vmatprep.subr.bf16.mxu0 %v4131_v1 }
  0xb0   : > { %3858 = vmatmul.mubr.bf16.vlgmr.msra.gmra.mrb[16].mxu1 %v1875_v4  ;;  %v4081_v4 = vld [vmem:[%s5154_s1 + $0x298] sm:$0xff]  }
  0xb1   : > { %3838 = vmatmul.mubr.bf16.vlgmr.msra.gmra.mrb[16].mxu0 %v4642_v33  ;;  %3882 = vmatpush3.bf16.msra.mxu1 %v4076_v41  ;;  %v4079_v33 = vld [vmem:[%s5154_s1 + $0x290] sm:$0xff]  }
  0xb2   : > { %3862 = vmatpush3.bf16.msra.mxu0 %v4075_v49  ;;  %3883 = vmatprep.subr.bf16.mxu1 %v4131_v1  ;;  %v2800_v49 = vrot.slane %v847_v45, %v4255_v30 }
  0xb3   : > { %3863 = vmatprep.subr.bf16.mxu0 %v4131_v1  ;;  %3877 = vmatprep.mubr.msk.bf16.mxu0 %vm4132_vm0, %v4131_v1 }
  0xb4   : > { %3897 = vmatprep.mubr.msk.bf16.mxu1 %vm4132_vm0, %v4131_v1 }
  0xb5   : > { %3884 = vmatpush3.bf16.msra.mxu1 %v4078_v3 }
  0xb6   : > { %3864 = vmatpush3.bf16.msra.mxu0 %v4077_v31  ;;  %3885 = vmatprep.subr.bf16.mxu1 %v4131_v1 }
  0xb7   : > { %3865 = vmatprep.subr.bf16.mxu0 %v4131_v1 }
  0xb9   : > { %3886 = vmatpush3.bf16.msra.mxu1 %v4080_v19 }
  0xba   : > { %3866 = vmatpush3.bf16.msra.mxu0 %v4079_v33  ;;  %3887 = vmatprep.subr.bf16.mxu1 %v4131_v1  ;;  %v4120_v33 = vld [vmem:[%s5154_s1 + $0x3f0] sm:$0xff]  }
  0xbb   : > { %3867 = vmatprep.subr.bf16.mxu0 %v4131_v1 }
  0xbd   : > { %3888 = vmatpush3.bf16.msra.mxu1 %v4082_v2  ;;  %v2647_v2 = vrot.slane %v2604_v35, %v4255_v30 }
  0xbe   : > { %3868 = vmatpush3.bf16.msra.mxu0 %v4081_v4  ;;  %3889 = vmatprep.subr.bf16.mxu1 %v4131_v1 }
  0xbf   : > { %3869 = vmatprep.subr.bf16.mxu0 %v4131_v1 }
  0xc1   : > { %3890 = vmatpush3.bf16.msra.mxu1 %v4084_v50 }
  0xc2   : > { %3870 = vmatpush3.bf16.msra.mxu0 %v4083_v63  ;;  %3891 = vmatprep.subr.bf16.mxu1 %v4131_v1 }
  0xc3   : > { %3871 = vmatprep.subr.bf16.mxu0 %v4131_v1 }
  0xc5   : > { %3892 = vmatpush3.bf16.msra.mxu1 %v4086_v27  ;;  %v2808_v27 = vrot.slane %v2801_v28, %v4255_v30 }
  0xc6   : > { %3872 = vmatpush3.bf16.msra.mxu0 %v4085_v6  ;;  %3893 = vmatprep.subr.bf16.mxu1 %v4131_v1  ;;  %v2815_v6 = vrot.slane %v2800_v49, %v4255_v30 }
  0xc7   : > { %3873 = vmatprep.subr.bf16.mxu0 %v4131_v1 }
  0xc8   : > { %v2816_v56 = vcombine.low %v2808_v27, %v2815_v6 }
  0xc9   : > { %3894 = vmatpush3.bf16.msra.mxu1 %v4088_v8  ;;  %v4122_v8 = vld [vmem:[%s5154_s1 + $0x3f8] sm:$0xff]  }
  0xca   : > { %3874 = vmatpush3.bf16.msra.mxu0 %v4087_v61  ;;  %3895 = vmatprep.subr.bf16.mxu1 %v4131_v1  ;;  %v2655_v61 = vrot.slane %v4822_v48, %v4255_v30 }
  0xcb   : > { %3875 = vmatprep.subr.bf16.mxu0 %v4131_v1 }
  0xcd   : > { %3896 = vmatpush3.bf16.msra.mxu1 %v4090_v11  ;;  %v2662_v11 = vrot.slane %v2647_v2, %v4255_v30 }
  0xce   : > { %3876 = vmatpush3.bf16.msra.mxu0 %v4089_v12  ;;  %3921 = vmatprep.subr.bf16.mxu1 %v4131_v1 }
  0xcf   : > { %3901 = vmatprep.subr.bf16.mxu0 %v4131_v1  ;;  %v2663_v28 = vcombine.low %v2655_v61, %v2662_v11 }
  0xd0   : > { %3898 = vmatmul.mubr.bf16.vlgmr.msra.gmra.mrb[20].mxu1 %v4678_v42  ;;  %v4095_v42 = vld [vmem:[%s5154_s1 + $0x310] sm:$0xff]  }
  0xd1   : > { %3878 = vmatmul.mubr.bf16.vlgmr.msra.gmra.mrb[20].mxu0 %v4657_v59  ;;  %3922 = vmatpush3.bf16.msra.mxu1 %v4092_v13  ;;  %v4096_v59 = vld [vmem:[%s5154_s1 + $0x350] sm:$0xff]  }
  0xd2   : > { %3902 = vmatpush3.bf16.msra.mxu0 %v4091_v17  ;;  %3923 = vmatprep.subr.bf16.mxu1 %v4131_v1 }
  0xd3   : > { %3903 = vmatprep.subr.bf16.mxu0 %v4131_v1  ;;  %3917 = vmatprep.mubr.msk.bf16.mxu0 %vm4132_vm0, %v4131_v1 }
  0xd4   : > { %3937 = vmatprep.mubr.msk.bf16.mxu1 %vm4132_vm0, %v4131_v1 }
  0xd5   : > { %3924 = vmatpush3.bf16.msra.mxu1 %v4094_v20 }
  0xd6   : > { %3904 = vmatpush3.bf16.msra.mxu0 %v4093_v62  ;;  %3925 = vmatprep.subr.bf16.mxu1 %v4131_v1 }
  0xd7   : > { %3905 = vmatprep.subr.bf16.mxu0 %v4131_v1 }
  0xd9   : > { %3926 = vmatpush3.bf16.msra.mxu1 %v4096_v59 }
  0xda   : > { %3906 = vmatpush3.bf16.msra.mxu0 %v4095_v42  ;;  %3927 = vmatprep.subr.bf16.mxu1 %v4131_v1 }
  0xdb   : > { %3907 = vmatprep.subr.bf16.mxu0 %v4131_v1 }
  0xdd   : > { %3928 = vmatpush3.bf16.msra.mxu1 %v4098_v16 }
  0xde   : > { %3908 = vmatpush3.bf16.msra.mxu0 %v4097_v22  ;;  %3929 = vmatprep.subr.bf16.mxu1 %v4131_v1 }
  0xdf   : > { %3909 = vmatprep.subr.bf16.mxu0 %v4131_v1 }
  0xe1   : > { %3930 = vmatpush3.bf16.msra.mxu1 %v4100_v44 }
  0xe2   : > { %3910 = vmatpush3.bf16.msra.mxu0 %v4099_v15  ;;  %3931 = vmatprep.subr.bf16.mxu1 %v4131_v1 }
  0xe3   : > { %3911 = vmatprep.subr.bf16.mxu0 %v4131_v1 }
  0xe5   : > { %3932 = vmatpush3.bf16.msra.mxu1 %v4102_v23 }
  0xe6   : > { %3912 = vmatpush3.bf16.msra.mxu0 %v4101_v39  ;;  %3933 = vmatprep.subr.bf16.mxu1 %v4131_v1 }
  0xe7   : > { %3913 = vmatprep.subr.bf16.mxu0 %v4131_v1 }
  0xe9   : > { %3934 = vmatpush3.bf16.msra.mxu1 %v4104_v0 }
  0xea   : > { %3914 = vmatpush3.bf16.msra.mxu0 %v4103_v46  ;;  %3935 = vmatprep.subr.bf16.mxu1 %v4131_v1 }
  0xeb   : > { %3915 = vmatprep.subr.bf16.mxu0 %v4131_v1 }
  0xed   : > { %3936 = vmatpush3.bf16.msra.mxu1 %v4106_v57 }
  0xee   : > { %3916 = vmatpush3.bf16.msra.mxu0 %v4105_v32  ;;  %3961 = vmatprep.subr.bf16.mxu1 %v4131_v1 }
  0xef   : > { %3941 = vmatprep.subr.bf16.mxu0 %v4131_v1 }
  0xf0   : > { %3938 = vmatmul.mubr.bf16.vlgmr.msra.gmra.mrb[24].mxu1 %v2510_v47 }
  0xf1   : > { %3918 = vmatmul.mubr.bf16.vlgmr.msra.gmra.mrb[24].mxu0 %v2358_v26  ;;  %3962 = vmatpush3.bf16.msra.mxu1 %v4108_v18 }
  0xf2   : > { %3942 = vmatpush3.bf16.msra.mxu0 %v4107_v52  ;;  %3963 = vmatprep.subr.bf16.mxu1 %v4131_v1 }
  0xf3   : > { %3943 = vmatprep.subr.bf16.mxu0 %v4131_v1  ;;  %3957 = vmatprep.mubr.msk.bf16.mxu0 %vm4132_vm0, %v4131_v1 }
  0xf4   : > { %3977 = vmatprep.mubr.msk.bf16.mxu1 %vm4132_vm0, %v4131_v1 }
  0xf5   : > { %3964 = vmatpush3.bf16.msra.mxu1 %v4110_v58 }
  0xf6   : > { %3944 = vmatpush3.bf16.msra.mxu0 %v4109_v25  ;;  %3965 = vmatprep.subr.bf16.mxu1 %v4131_v1 }
  0xf7   : > { %3945 = vmatprep.subr.bf16.mxu0 %v4131_v1 }
  0xf9   : > { %3966 = vmatpush3.bf16.msra.mxu1 %v4112_v43 }
  0xfa   : > { %3946 = vmatpush3.bf16.msra.mxu0 %v4111_v5  ;;  %3967 = vmatprep.subr.bf16.mxu1 %v4131_v1 }
  0xfb   : > { %3947 = vmatprep.subr.bf16.mxu0 %v4131_v1 }
  0xfd   : > { %3968 = vmatpush3.bf16.msra.mxu1 %v4114_v21 }
  0xfe   : > { %3948 = vmatpush3.bf16.msra.mxu0 %v4113_v55  ;;  %3969 = vmatprep.subr.bf16.mxu1 %v4131_v1 }
  0xff   : > { %3949 = vmatprep.subr.bf16.mxu0 %v4131_v1 }
 0x101   : > { %3970 = vmatpush3.bf16.msra.mxu1 %v4116_v54 }
 0x102   : > { %3950 = vmatpush3.bf16.msra.mxu0 %v4115_v7  ;;  %3971 = vmatprep.subr.bf16.mxu1 %v4131_v1 }
 0x103   : > { %v681_v37 = vpop.f32.mrb[0].mxu1  ;;  %3951 = vmatprep.subr.bf16.mxu0 %v4131_v1 }
 0x104   : > { %v547_v38 = vpop.f32.mrb[0].mxu0  ;;  %v3699_v41 = vpop.f32.mrb[1].mxu1 }
 0x105   : > { %v682_v3 = vadd.f32 %v681_v37, %v547_v38  ;;  %v3679_v31 = vpop.f32.mrb[1].mxu0  ;;  %3972 = vmatpush3.bf16.msra.mxu1 %v4118_v34  ;;  %v684_v19 = vpop.f32.mrb[2].mxu1 }
 0x106   : > { %3952 = vmatpush3.bf16.msra.mxu0 %v4117_v36  ;;  %v550_v4 = vpop.f32.mrb[2].mxu0  ;;  %v3700_v50 = vpop.f32.mrb[3].mxu1  ;;  %3973 = vmatprep.subr.bf16.mxu1 %v4131_v1 }
 0x107   : > { %v685_v45 = vadd.f32 %v684_v19, %v550_v4  ;;  %v3680_v63 = vpop.f32.mrb[3].mxu0  ;;  %3953 = vmatprep.subr.bf16.mxu0 %v4131_v1 }
 0x109   : > { %3974 = vmatpush3.bf16.msra.mxu1 %v4120_v33 }
 0x10a   : > { %3954 = vmatpush3.bf16.msra.mxu0 %v4119_v29  ;;  %3975 = vmatprep.subr.bf16.mxu1 %v4131_v1 }
 0x10b   : > { %3955 = vmatprep.subr.bf16.mxu0 %v4131_v1 }
 0x10d   : > { %3976 = vmatpush3.bf16.msra.mxu1 %v4122_v8 }
 0x10e   : > { %3956 = vmatpush3.bf16.msra.mxu0 %v4121_v60 }
 0x110   : > { %3978 = vmatmul.mubr.bf16.vlgmr.msra.gmra.mrb[28].mxu1 %v2816_v56 }
 0x111   : > { %3958 = vmatmul.mubr.bf16.vlgmr.msra.gmra.mrb[28].mxu0 %v2663_v28 }
 0x123   : > { %v994_v12 = vpop.f32.mrb[4].mxu1 }
 0x124   : > { %v838_v13 = vpop.f32.mrb[4].mxu0  ;;  %v3739_v48 = vpop.f32.mrb[5].mxu1 }
 0x125   : > { %v845_v17 = vadd.f32 %v838_v13, %v682_v3  ;;  %v3719_v20 = vpop.f32.mrb[5].mxu0  ;;  %v997_v62 = vpop.f32.mrb[6].mxu1 }
 0x126   : > { %v841_v59 = vpop.f32.mrb[6].mxu0  ;;  %v3740_v42 = vpop.f32.mrb[7].mxu1 }
 0x127   : > { %v1001_v16 = vadd.f32 %v994_v12, %v845_v17  ;;  %v846_v22 = vadd.f32 %v841_v59, %v685_v45  ;;  %v3720_v44 = vpop.f32.mrb[7].mxu0 }
 0x129   : > { %v1002_v15 = vadd.f32 %v997_v62, %v846_v22 }
 0x143   : > { %v1324_v23 = vpop.f32.mrb[8].mxu1 }
 0x144   : > { %v1172_v1 = vpop.f32.mrb[8].mxu0  ;;  %v3779_v9 = vpop.f32.mrb[9].mxu1 }
 0x145   : > { %v1179_v39 = vadd.f32 %v1172_v1, %v1001_v16  ;;  %v3759_v14 = vpop.f32.mrb[9].mxu0  ;;  %v1327_v0 = vpop.f32.mrb[10].mxu1 }
 0x146   : > { %v1175_v51 = vpop.f32.mrb[10].mxu0  ;;  %v3780_v46 = vpop.f32.mrb[11].mxu1 }
 0x147   : > { %v1331_v53 = vadd.f32 %v1324_v23, %v1179_v39  ;;  %v1180_v10 = vadd.f32 %v1175_v51, %v1002_v15  ;;  %v3760_v57 = vpop.f32.mrb[11].mxu0  ;;  %v3510_v39 = vld [vmem:[%s5155_s2] ss:$0 sm:$0xff] }
 0x149   : > { %v1332_v24 = vadd.f32 %v1327_v0, %v1180_v10 }
 0x163   : > { %v1630_v40 = vpop.f32.mrb[12].mxu1 }
 0x164   : > { %v1477_v32 = vpop.f32.mrb[12].mxu0  ;;  %v3819_v47 = vpop.f32.mrb[13].mxu1 }
 0x165   : > { %v1484_v26 = vadd.f32 %v1477_v32, %v1331_v53  ;;  %v3799_v18 = vpop.f32.mrb[13].mxu0  ;;  %v1633_v52 = vpop.f32.mrb[14].mxu1 }
 0x166   : > { %v1480_v58 = vpop.f32.mrb[14].mxu0  ;;  %v3820_v25 = vpop.f32.mrb[15].mxu1 }
 0x167   : > { %v1637_v43 = vadd.f32 %v1630_v40, %v1484_v26  ;;  %v1485_v5 = vadd.f32 %v1480_v58, %v1332_v24  ;;  %v3800_v21 = vpop.f32.mrb[15].mxu0 }
 0x169   : > { %v1638_v55 = vadd.f32 %v1633_v52, %v1485_v5 }
 0x183   : > { %v1959_v54 = vpop.f32.mrb[16].mxu1 }
 0x184   : > { %v1807_v7 = vpop.f32.mrb[16].mxu0  ;;  %v3859_v34 = vpop.f32.mrb[17].mxu1 }
 0x185   : > { %v1814_v35 = vadd.f32 %v1807_v7, %v1637_v43  ;;  %v3839_v36 = vpop.f32.mrb[17].mxu0  ;;  %v1962_v37 = vpop.f32.mrb[18].mxu1 }
 0x186   : > { %v1810_v38 = vpop.f32.mrb[18].mxu0  ;;  %v3860_v41 = vpop.f32.mrb[19].mxu1 }
 0x187   : > { %v1966_v49 = vadd.f32 %v1959_v54, %v1814_v35  ;;  %v1815_v3 = vadd.f32 %v1810_v38, %v1638_v55  ;;  %v3840_v31 = vpop.f32.mrb[19].mxu0 }
 0x189   : > { %v1967_v19 = vadd.f32 %v1962_v37, %v1815_v3 }
 0x1a3   : > { %v2265_v33 = vpop.f32.mrb[20].mxu1 }
 0x1a4   : > { %v2112_v2 = vpop.f32.mrb[20].mxu0  ;;  %v3899_v4 = vpop.f32.mrb[21].mxu1 }
 0x1a5   : > { %v2119_v50 = vadd.f32 %v2112_v2, %v1966_v49  ;;  %v3879_v29 = vpop.f32.mrb[21].mxu0  ;;  %v2268_v45 = vpop.f32.mrb[22].mxu1 }
 0x1a6   : > { %v2115_v63 = vpop.f32.mrb[22].mxu0  ;;  %v3900_v27 = vpop.f32.mrb[23].mxu1 }
 0x1a7   : > { %v2272_v6 = vadd.f32 %v2265_v33, %v2119_v50  ;;  %v2120_v8 = vadd.f32 %v2115_v63, %v1967_v19  ;;  %v3880_v61 = vpop.f32.mrb[23].mxu0 }
 0x1a9   : > { %v2273_v11 = vadd.f32 %v2268_v45, %v2120_v8 }
 0x1c3   : > { %v2594_v60 = vpop.f32.mrb[24].mxu1 }
 0x1c4   : > { %v2442_v56 = vpop.f32.mrb[24].mxu0  ;;  %v3939_v28 = vpop.f32.mrb[25].mxu1 }
 0x1c5   : > { %v2449_v12 = vadd.f32 %v2442_v56, %v2272_v6  ;;  %v3919_v13 = vpop.f32.mrb[25].mxu0  ;;  %v2597_v48 = vpop.f32.mrb[26].mxu1 }
 0x1c6   : > { %v2445_v17 = vpop.f32.mrb[26].mxu0  ;;  %v3940_v20 = vpop.f32.mrb[27].mxu1 }
 0x1c7   : > { %v2601_v62 = vadd.f32 %v2594_v60, %v2449_v12  ;;  %v2450_v59 = vadd.f32 %v2445_v17, %v2273_v11  ;;  %v3920_v42 = vpop.f32.mrb[27].mxu0 }
 0x1c9   : > { %v2602_v16 = vadd.f32 %v2597_v48, %v2450_v59 }
 0x1e3   : > { %v2900_v22 = vpop.f32.mrb[28].mxu1 }
 0x1e4   : > { %v2747_v44 = vpop.f32.mrb[28].mxu0  ;;  %v3979_v15 = vpop.f32.mrb[29].mxu1 }
 0x1e5   : > { %v2754_v23 = vadd.f32 %v2747_v44, %v2601_v62  ;;  %v3959_v1 = vpop.f32.mrb[29].mxu0  ;;  %v2903_v9 = vpop.f32.mrb[30].mxu1 }
 0x1e6   : > { %v2750_v14 = vpop.f32.mrb[30].mxu0  ;;  %v3980_v0 = vpop.f32.mrb[31].mxu1 }
 0x1e7   : > { %v2907_v51 = vadd.f32 %v2900_v22, %v2754_v23  ;;  %v2755_v46 = vadd.f32 %v2750_v14, %v2602_v16  ;;  %v3960_v53 = vpop.f32.mrb[31].mxu0 }
 0x1e9   : > { %v2916_v10 = vadd.f32 %v3510_v39, %v2907_v51  ;;  %v2908_v57 = vadd.f32 %v2903_v9, %v2755_v46 }
 0x1eb   : > { %v2920_v24 = vcombine.high %v2916_v10, %v2916_v10  ;;  %v2927_v40 = vrot.slane %v2916_v10, %v4255_v30  ;;  %v2917_v32 = vadd.f32 %v3510_v39, %v2908_v57 }
 0x1ed   : > { %v2934_v47 = vrot.slane %v2920_v24, %v4255_v30  ;;  %v2935_v26 = vcombine.high %v2927_v40, %v2927_v40  ;;  %v2943_v18 = vrot.slane %v2927_v40, %v4255_v30  ;;  %v2975_v52 = vrot.slane %v2917_v32, %v4255_v30 }
 0x1ef   : > { %v2936_v58 = vcombine.high %v2934_v47, %v2934_v47  ;;  %v2957_v25 = vrot.slane %v2935_v26, %v4255_v30  ;;  %v2965_v43 = vcombine.high %v2943_v18, %v2943_v18  ;;  %v2982_v5 = vrot.slane %v2975_v52, %v4255_v30 }
 0x1f0   : > { %v2950_v21 = vrot.slane %v2934_v47, %v4255_v30 }
 0x1f1   : > { %v2964_v55 = vrot.slane %v2936_v58, %v4255_v30  ;;  %v2967_v54 = vcombine.high %v2957_v25, %v2957_v25  ;;  %v2983_v7 = vcombine.low %v2943_v18, %v2957_v25  ;;  %v2997_v35 = vrot.slane %v2965_v43, %v4255_v30 }
 0x1f2   : > { %v3043_v38 = vrot.slane %v2982_v5, %v4255_v30 }
 0x1f3   : > { %v2990_v34 = vrot.slane %v2983_v7, %v4255_v30  ;;  %v3006_v36 = vcombine.low %v2967_v54, %v2950_v21  ;;  %v3511_v37 = vcombine.high %v2950_v21, %v2964_v55  ;;  %v3020_v3 = vrot.slane %v2964_v55, %v4255_v30 }
 0x1f5   : > { %v2998_v41 = vcombine.low %v2990_v34, %v2997_v35  ;;  %v3013_v49 = vrot.slane %v3006_v36, %v4255_v30  ;;  %v3036_v31 = vrot.slane %v3511_v37, %v4255_v30 }
 0x1f7   : > { %v3021_v19 = vcombine.low %v3013_v49, %v3020_v3  ;;  %3512 = vst.sshfl [vmem:[%s224_s12] sm:$0x15 pattern:$0x73625140] %v2998_v41  ;;  %v3044_v33 = vcombine.low %v3036_v31, %v3043_v38 }
 0x1f9   : > { %3513 = vst.sshfl [vmem:[%s224_s12 + $0x4] sm:$0x15 pattern:$0x73625140] %v3021_v19 }
 0x1fa   : > { %3514 = vst.sshfl [vmem:[%s224_s12 + $0x8] sm:$0x15 pattern:$0x73625140] %v3044_v33 }
 0x1fb PF: > { %s15_s18 = sadd.s32 1, %s4129_s18  }
 0x1fc   : > { %p12_p4 = scmp.ge.s32.totalorder %s15_s18, 4  }
 0x1fe   :  { %14 = sbr.rel (!%p12_p4) target bundleno = 1 (0x1), region = 85 }

</bundles_post_ra>
